<compile_context>
chip_gen: v7x
topology: tpu7x:2x2x1
jax: 0.10.0
libtpu: 0.0.40
codegen_flags: <defaults>
</compile_context>

<pallas_src>
import functools

import jax
import jax.numpy as jnp
from jax import lax
from jax.experimental import pallas as pl
from jax.experimental.pallas import tpu as pltpu

LANE = 128
SUBLANE = 8


def _round_up(x, m):
    return (x + m - 1) // m * m


# ----------------------------------------------------------------------------
# Fused forward kernel (single invocation, no grid)
# ----------------------------------------------------------------------------
def _fused_forward_kernel(num_layers, b_real, seq_len, b_pad, hidden, *refs):
    """refs = (x2d, in_gamma, in_beta,
               [w_ih_l (D_l,4H) bf16, w_hh_l (H,4H) bf16, b_l (1,4H) f32] * L,
               hid_gamma, hid_beta, fc_w_pad (H,128), fc_b_pad (1,128),  # in
               out (Bp, 128),                                            # out
               gx (T*Bp, 4H) f32, whh (H, 4H) f32 [, hseq (T*Bp, H) f32])# scratch
    """
    f32 = jnp.float32
    n_in = 3 + 3 * num_layers + 4
    x_ref, in_g_ref, in_b_ref = refs[0:3]
    layer_refs = refs[3:3 + 3 * num_layers]
    hid_g_ref, hid_b_ref, fc_w_ref, fc_b_ref = refs[3 + 3 * num_layers:n_in]
    o_ref = refs[n_in]
    scratch = refs[n_in + 1:]
    gx_sc = scratch[0]                       # (T*Bp, 4H) gate-packed
    whh_sc = scratch[1]                      # (H, 4H)    f32 recurrent weights
    hseq_sc = scratch[2] if num_layers > 1 else None

    T, Bp, H = seq_len, b_pad, hidden
    H4 = 4 * H
    N = T * Bp

    # ---- input BatchNorm1d (training mode: batch stats) --------------------
    # Padded batch rows of x are exact zeros (jnp.pad), so they contribute
    # nothing to sum(x) / sum(x^2); divide by the real count only.
    x = x_ref[...].astype(f32)                                    # (N, D)
    inv_n = 1.0 / float(T * b_real)
    mean = jnp.sum(x, axis=0, keepdims=True) * inv_n
    var = jnp.sum(x * x, axis=0, keepdims=True) * inv_n - mean * mean
    var = jnp.maximum(var, 0.0)              # guard single-pass cancellation
    cur = (x - mean) * lax.rsqrt(var + 1e-5) * in_g_ref[...] + in_b_ref[...]
    # NOTE: pad rows of `cur` are now non-zero normalized garbage; they stay
    # row-local through the LSTM and are masked out of the hidden-BN stats.

    # ---- LSTM stack (all layers in-kernel, sequence stays in VMEM) ---------
    h_last = None
    for l in range(num_layers):
        w_ih_ref = layer_refs[3 * l]         # (D_l, 4H) bf16, gate-packed
        w_hh_ref = layer_refs[3 * l + 1]     # (H,  4H) bf16, gate-packed
        b_ref = layer_refs[3 * l + 2]        # (1,  4H) f32   (b_ih + b_hh = 0)

        # Hoisted, gate-packed input projection: ONE batched MXU matmul over
        # all timesteps, lane-dense (N, 4H) store.
        gx_sc[...] = (jnp.dot(cur, w_ih_ref[...].astype(f32),
                              preferred_element_type=f32) + b_ref[...])

        # Recurrent weights: upcast once per layer into VMEM (not vregs) and
        # stream from there inside the serial time loop.
        # TODO(synk): pltpu.matmul_push_rhs could pin W_hh in the MXU staging
        # registers across all T steps instead of re-streaming from VMEM.
        whh_sc[...] = w_hh_ref[...].astype(f32)

        last_layer = (l == num_layers - 1)

        def step(t, carry, last_layer=last_layer):
            h, c = carry
            base = pl.multiple_of(t * Bp, Bp)
            # One gate-packed matmul per step; split gates on the lane axis.
            z = gx_sc[pl.ds(base, Bp), :] + jnp.dot(
                h, whh_sc[...], preferred_element_type=f32)        # (Bp, 4H)
            i_t = jax.nn.sigmoid(z[:, 0 * H:1 * H])
            f_t = jax.nn.sigmoid(z[:, 1 * H:2 * H])
            g_t = jnp.tanh(z[:, 2 * H:3 * H])
            o_t = jax.nn.sigmoid(z[:, 3 * H:4 * H])
            c_new = f_t * c + i_t * g_t
            h_new = o_t * jnp.tanh(c_new)
            if not last_layer:
                # Only intermediate layers need the full sequence; the last
                # layer only feeds its final h to hidden-BN/FC.
                hseq_sc[pl.ds(base, Bp), :] = h_new
            return h_new, c_new

        h0 = jnp.zeros((Bp, H), f32)
        c0 = jnp.zeros((Bp, H), f32)
        # Bounded unroll: full unroll only for short sequences, else keep code
        # size / live ranges in check while preserving LLO visibility.
        unroll = True if T <= 16 else 4
        h_last, _ = lax.fori_loop(0, T, step, (h0, c0), unroll=unroll)

        if not last_layer:
            # TODO(synk): inter-layer dropout would be applied here (dropout=0).
            cur = hseq_sc[...]

    # ---- hidden BatchNorm1d (batch stats over real rows) + Linear(H, 1) ----
    brow = lax.broadcasted_iota(jnp.int32, (Bp, 1), 0)
    bmask = (brow < b_real).astype(f32)      # pad rows hold garbage -> mask
    hm = h_last * bmask
    inv_b = 1.0 / float(b_real)
    hmean = jnp.sum(hm, axis=0, keepdims=True) * inv_b
    hvar = jnp.sum(hm * hm, axis=0, keepdims=True) * inv_b - hmean * hmean
    hvar = jnp.maximum(hvar, 0.0)
    hn = ((h_last - hmean) * lax.rsqrt(hvar + 1e-5)
          * hid_g_ref[...] + hid_b_ref[...])
    # fc_w is zero-padded to (H, 128) so the store is a full lane-dense vreg.
    o_ref[...] = (jnp.dot(hn, fc_w_ref[...], preferred_element_type=f32)
                  + fc_b_ref[...]).astype(o_ref.dtype)


def fused_forward(x2d, params, *, b_real, seq_len, b_pad, hidden, num_layers):
    N = x2d.shape[0]
    H4 = 4 * hidden

    inputs = [x2d,
              params["input_bn_gamma"].reshape(1, -1),
              params["input_bn_beta"].reshape(1, -1)]
    for (w_ih, w_hh, b) in params["lstm_layers"]:
        inputs += [w_ih, w_hh, b]
    inputs += [params["hidden_bn_gamma"].reshape(1, -1),
               params["hidden_bn_beta"].reshape(1, -1),
               params["fc_w_pad"], params["fc_b_pad"]]

    scratch_shapes = [pltpu.VMEM((N, H4), jnp.float32),       # gate-packed gx
                      pltpu.VMEM((hidden, H4), jnp.float32)]  # f32 W_hh staging
    if num_layers > 1:
        scratch_shapes.append(pltpu.VMEM((N, hidden), jnp.float32))  # hseq

    # Size the scoped-VMEM limit from the actual footprint (defaults: 16 MiB on
    # v5e, 32 MiB on v6e/v7x). Cap at 64 MiB so it still fits v7x's physical
    # per-TC VMEM.
    in_bytes = sum(int(a.size) * a.dtype.itemsize for a in inputs)
    out_bytes = b_pad * LANE * x2d.dtype.itemsize
    scratch_bytes = 4 * (N * H4 + hidden * H4
                         + (N * hidden if num_layers > 1 else 0))
    vmem_limit = int(min(max(2 * (in_bytes + out_bytes + scratch_bytes)
                             + (4 << 20), 32 << 20), 64 << 20))

    kernel = functools.partial(_fused_forward_kernel, num_layers, b_real,
                               seq_len, b_pad, hidden)
    return pl.pallas_call(
        kernel,
        out_shape=jax.ShapeDtypeStruct((b_pad, LANE), x2d.dtype),
        scratch_shapes=scratch_shapes,
        compiler_params=pltpu.CompilerParams(vmem_limit_bytes=vmem_limit),
    )(*inputs)


# ----------------------------------------------------------------------------
# Parameter construction (mirrors LSTM.__init__ + _init_weights)
# ----------------------------------------------------------------------------
def xavier_normal(key, shape):
    fan_out, fan_in = shape
    std = (2.0 / (fan_in + fan_out)) ** 0.5
    return std * jax.random.normal(key, shape, dtype=jnp.float32)


def make_params(key, input_size, hidden_size, num_layers,
                weight_dtype=jnp.bfloat16):
    params = {
        "input_bn_gamma": jnp.ones((input_size,), jnp.float32),
        "input_bn_beta": jnp.zeros((input_size,), jnp.float32),
        "hidden_bn_gamma": jnp.ones((hidden_size,), jnp.float32),
        "hidden_bn_beta": jnp.zeros((hidden_size,), jnp.float32),
    }
    layers = []
    for layer in range(num_layers):
        in_dim = input_size if layer == 0 else hidden_size
        key, k1, k2 = jax.random.split(key, 3)
        # PyTorch stores weight_ih_l{l} as (4H, in) with gate row blocks
        # [i, f, g, o]; xavier over the full matrix (as _init_weights does),
        # then transpose to the gate-PACKED (in, 4H) layout the kernel uses.
        # Stored bf16 (exact upcast in-kernel keeps f32-reference parity).
        w_ih = xavier_normal(k1, (4 * hidden_size, in_dim)).T.astype(weight_dtype)
        w_hh = xavier_normal(k2, (4 * hidden_size, hidden_size)).T.astype(weight_dtype)
        b = jnp.zeros((1, 4 * hidden_size), jnp.float32)   # b_ih + b_hh = 0
        layers.append((w_ih, w_hh, b))
    params["lstm_layers"] = layers

    key, kf = jax.random.split(key)
    fc_w = xavier_normal(kf, (1, hidden_size)).T                  # (H, 1)
    params["fc_w_pad"] = jnp.pad(fc_w, ((0, 0), (0, LANE - 1)))   # (H, 128)
    params["fc_b_pad"] = jnp.zeros((1, LANE), jnp.float32)
    return params


# ----------------------------------------------------------------------------
# Forward pass wrapper
# ----------------------------------------------------------------------------
@jax.jit
def lstm_model_forward(params, x):
    # x: (B, T, D), batch_first like the PyTorch module.
    B, T, D = x.shape
    H = params["hidden_bn_gamma"].shape[0]
    num_layers = len(params["lstm_layers"])

    Bp = _round_up(max(B, SUBLANE), SUBLANE)          # pad batch to sublanes
    x_tb = jnp.transpose(x, (1, 0, 2))                # time-major (T, B, D)
    x_pad = jnp.pad(x_tb, ((0, 0), (0, Bp - B), (0, 0)))   # zero pad rows
    x2d = x_pad.reshape(T * Bp, D)                    # rows: t-major, b-minor

    out_pad = fused_forward(x2d, params, b_real=B, seq_len=T, b_pad=Bp,
                            hidden=H, num_layers=num_layers)  # (Bp, 128)
    return out_pad[:B, 0]                             # squeeze -> (B,)


# ----------------------------------------------------------------------------
# Pure-JAX reference for validation
# ----------------------------------------------------------------------------
def reference_forward(params, x):
    B, T, D = x.shape
    H = params["hidden_bn_gamma"].shape[0]

    xf = x.reshape(B * T, D).astype(jnp.float32)
    mean = jnp.mean(xf, axis=0, keepdims=True)
    var = jnp.mean((xf - mean) ** 2, axis=0, keepdims=True)
    xf = ((xf - mean) * lax.rsqrt(var + 1e-5)
          * params["input_bn_gamma"][None, :] + params["input_bn_beta"][None, :])
    seq = xf.reshape(B, T, D)

    for (w_ih, w_hh, b) in params["lstm_layers"]:
        wi = w_ih.astype(jnp.float32)     # (D_l, 4H) gate-packed
        wh = w_hh.astype(jnp.float32)     # (H,  4H)
        h = jnp.zeros((B, H), jnp.float32)
        c = jnp.zeros((B, H), jnp.float32)
        outs = []
        for t in range(T):
            z = seq[:, t, :] @ wi + h @ wh + b
            i_g = jax.nn.sigmoid(z[:, 0 * H:1 * H])
            f_g = jax.nn.sigmoid(z[:, 1 * H:2 * H])
            g_g = jnp.tanh(z[:, 2 * H:3 * H])
            o_g = jax.nn.sigmoid(z[:, 3 * H:4 * H])
            c = f_g * c + i_g * g_g
            h = o_g * jnp.tanh(c)
            outs.append(h)
        seq = jnp.stack(outs, axis=1)

    last = seq[:, -1, :]
    mean = jnp.mean(last, axis=0, keepdims=True)
    var = jnp.mean((last - mean) ** 2, axis=0, keepdims=True)
    ln = ((last - mean) * lax.rsqrt(var + 1e-5)
          * params["hidden_bn_gamma"][None, :] + params["hidden_bn_beta"][None, :])
    return (ln @ params["fc_w_pad"][:, :1] + params["fc_b_pad"][0, 0])[:, 0]


# ----------------------------------------------------------------------------
if __name__ == "__main__":
    batch, seq_len = 4, 8
    input_size, hidden_size, num_layers = 16, 32, 2

    key = jax.random.PRNGKey(0)
    key, kx, kp = jax.random.split(key, 3)
    x = jax.random.normal(kx, (batch, seq_len, input_size), dtype=jnp.float32)
    params = make_params(kp, input_size, hidden_size, num_layers)

    out = lstm_model_forward(params, x)
    out = jax.block_until_ready(out)

    ref = reference_forward(params, x)
    assert out.shape == (batch,), out.shape
    assert jnp.allclose(out, ref, atol=2e-4, rtol=2e-4), (out, ref)

    print("KERNEL_OK")
</pallas_src>

<mosaic_0001>
module attributes {stable_mosaic.version = 11 : i64} {
  func.func @_fused_forward_kernel(%arg0: memref<64x16xf32, #tpu.memory_space<vmem>>, %arg1: memref<1x16xf32, #tpu.memory_space<vmem>>, %arg2: memref<1x16xf32, #tpu.memory_space<vmem>>, %arg3: memref<16x128xbf16, #tpu.memory_space<vmem>>, %arg4: memref<32x128xbf16, #tpu.memory_space<vmem>>, %arg5: memref<1x128xf32, #tpu.memory_space<vmem>>, %arg6: memref<32x128xbf16, #tpu.memory_space<vmem>>, %arg7: memref<32x128xbf16, #tpu.memory_space<vmem>>, %arg8: memref<1x128xf32, #tpu.memory_space<vmem>>, %arg9: memref<1x32xf32, #tpu.memory_space<vmem>>, %arg10: memref<1x32xf32, #tpu.memory_space<vmem>>, %arg11: memref<32x128xf32, #tpu.memory_space<vmem>>, %arg12: memref<1x128xf32, #tpu.memory_space<vmem>>, %arg13: memref<8x128xf32, #tpu.memory_space<vmem>>, %arg14: memref<64x128xf32, #tpu.memory_space<vmem>>, %arg15: memref<32x128xf32, #tpu.memory_space<vmem>>, %arg16: memref<64x32xf32, #tpu.memory_space<vmem>>) attributes {dimension_semantics = [], scalar_prefetch = 0 : i64, scratch_operands = 3 : i64, tpu.core_type = #tpu.core_type<tc>} {
    %c0 = arith.constant 0 : index
    %c0_0 = arith.constant 0 : index
    %0 = vector.load %arg0[%c0, %c0_0] : memref<64x16xf32, #tpu.memory_space<vmem>>, vector<64x16xf32>
    %cst = arith.constant dense<0.000000e+00> : vector<16xf32>
    %1 = vector.multi_reduction <add>, %0, %cst [0] : vector<64x16xf32> to vector<16xf32>
    %2 = vector.shape_cast %1 : vector<16xf32> to vector<1x16xf32>
    %cst_1 = arith.constant 3.125000e-02 : f32
    %3 = vector.broadcast %cst_1 : f32 to vector<1x16xf32>
    %4 = arith.mulf %2, %3 : vector<1x16xf32>
    %5 = arith.mulf %0, %0 : vector<64x16xf32>
    %cst_2 = arith.constant dense<0.000000e+00> : vector<16xf32>
    %6 = vector.multi_reduction <add>, %5, %cst_2 [0] : vector<64x16xf32> to vector<16xf32>
    %7 = vector.shape_cast %6 : vector<16xf32> to vector<1x16xf32>
    %cst_3 = arith.constant 3.125000e-02 : f32
    %8 = vector.broadcast %cst_3 : f32 to vector<1x16xf32>
    %9 = arith.mulf %7, %8 : vector<1x16xf32>
    %10 = arith.mulf %4, %4 : vector<1x16xf32>
    %11 = arith.subf %9, %10 : vector<1x16xf32>
    %cst_4 = arith.constant 0.000000e+00 : f32
    %12 = vector.broadcast %cst_4 : f32 to vector<1x16xf32>
    %13 = arith.maximumf %11, %12 : vector<1x16xf32>
    %14 = vector.broadcast %4 : vector<1x16xf32> to vector<64x16xf32>
    %15 = arith.subf %0, %14 : vector<64x16xf32>
    %cst_5 = arith.constant 9.99999974E-6 : f32
    %16 = vector.broadcast %cst_5 : f32 to vector<1x16xf32>
    %17 = arith.addf %13, %16 : vector<1x16xf32>
    %18 = math.rsqrt %17 : vector<1x16xf32>
    %19 = vector.broadcast %18 : vector<1x16xf32> to vector<64x16xf32>
    %20 = arith.mulf %15, %19 : vector<64x16xf32>
    %c0_6 = arith.constant 0 : index
    %c0_7 = arith.constant 0 : index
    %21 = vector.load %arg1[%c0_6, %c0_7] : memref<1x16xf32, #tpu.memory_space<vmem>>, vector<1x16xf32>
    %22 = vector.broadcast %21 : vector<1x16xf32> to vector<64x16xf32>
    %23 = arith.mulf %20, %22 : vector<64x16xf32>
    %c0_8 = arith.constant 0 : index
    %c0_9 = arith.constant 0 : index
    %24 = vector.load %arg2[%c0_8, %c0_9] : memref<1x16xf32, #tpu.memory_space<vmem>>, vector<1x16xf32>
    %25 = vector.broadcast %24 : vector<1x16xf32> to vector<64x16xf32>
    %26 = arith.addf %23, %25 : vector<64x16xf32>
    %c0_10 = arith.constant 0 : index
    %c0_11 = arith.constant 0 : index
    %27 = vector.load %arg3[%c0_10, %c0_11] : memref<16x128xbf16, #tpu.memory_space<vmem>>, vector<16x128xbf16>
    %28 = arith.extf %27 : vector<16x128xbf16> to vector<16x128xf32>
    %cst_12 = arith.constant dense<0.000000e+00> : vector<64x128xf32>
    %29 = tpu.matmul %26, %28, %cst_12 {dimension_numbers = #tpu.dot_dimension_numbers<[1], [0], [0], [1], [0, 0, 1, 1], [], []>} : vector<64x16xf32>, vector<16x128xf32>, vector<64x128xf32> -> vector<64x128xf32>
    %c0_13 = arith.constant 0 : index
    %c0_14 = arith.constant 0 : index
    %30 = vector.load %arg5[%c0_13, %c0_14] : memref<1x128xf32, #tpu.memory_space<vmem>>, vector<1x128xf32>
    %31 = vector.broadcast %30 : vector<1x128xf32> to vector<64x128xf32>
    %32 = arith.addf %29, %31 : vector<64x128xf32>
    %c0_15 = arith.constant 0 : index
    %c0_16 = arith.constant 0 : index
    %33 = vector.load %arg14[%c0_15, %c0_16] : memref<64x128xf32, #tpu.memory_space<vmem>>, vector<64x128xf32>
    tpu.vector_store %arg14[%c0_15, %c0_16], %32 {strides = array<i32>} : memref<64x128xf32, #tpu.memory_space<vmem>>, vector<64x128xf32>,
    %c0_17 = arith.constant 0 : index
    %c0_18 = arith.constant 0 : index
    %34 = vector.load %arg4[%c0_17, %c0_18] : memref<32x128xbf16, #tpu.memory_space<vmem>>, vector<32x128xbf16>
    %35 = arith.extf %34 : vector<32x128xbf16> to vector<32x128xf32>
    %c0_19 = arith.constant 0 : index
    %c0_20 = arith.constant 0 : index
    %36 = vector.load %arg15[%c0_19, %c0_20] : memref<32x128xf32, #tpu.memory_space<vmem>>, vector<32x128xf32>
    tpu.vector_store %arg15[%c0_19, %c0_20], %35 {strides = array<i32>} : memref<32x128xf32, #tpu.memory_space<vmem>>, vector<32x128xf32>,
    %cst_21 = arith.constant 0.000000e+00 : f32
    %37 = vector.broadcast %cst_21 : f32 to vector<8x32xf32>
    %cst_22 = arith.constant 0.000000e+00 : f32
    %38 = vector.broadcast %cst_22 : f32 to vector<8x32xf32>
    %c0_i32 = arith.constant 0 : i32
    %c8_i32 = arith.constant 8 : i32
    %39 = arith.muli %c0_i32, %c8_i32 : i32
    %40 = tpu.assume_multiple %39, 8 : i32
    %41 = arith.index_cast %40 : i32 to index
    %c0_23 = arith.constant 0 : index
    %42 = vector.load %arg14[%41, %c0_23] : memref<64x128xf32, #tpu.memory_space<vmem>>, vector<8x128xf32>
    %c0_24 = arith.constant 0 : index
    %c0_25 = arith.constant 0 : index
    %43 = vector.load %arg15[%c0_24, %c0_25] : memref<32x128xf32, #tpu.memory_space<vmem>>, vector<32x128xf32>
    %cst_26 = arith.constant dense<0.000000e+00> : vector<8x128xf32>
    %44 = tpu.matmul %37, %43, %cst_26 {dimension_numbers = #tpu.dot_dimension_numbers<[1], [0], [0], [1], [0, 0, 1, 1], [], []>} : vector<8x32xf32>, vector<32x128xf32>, vector<8x128xf32> -> vector<8x128xf32>
    %45 = arith.addf %42, %44 : vector<8x128xf32>
    %46 = vector.extract_strided_slice %45 {offsets = [0, 0], sizes = [8, 32], strides = [1, 1]} : vector<8x128xf32> to vector<8x32xf32>
    %47 = arith.negf %46 : vector<8x32xf32>
    %48 = math.exp %47 : vector<8x32xf32>
    %cst_27 = arith.constant 1.000000e+00 : f32
    %49 = vector.broadcast %cst_27 : f32 to vector<8x32xf32>
    %50 = arith.addf %49, %48 : vector<8x32xf32>
    %51 = arith.divf %49, %50 : vector<8x32xf32>
    %52 = vector.extract_strided_slice %45 {offsets = [0, 32], sizes = [8, 32], strides = [1, 1]} : vector<8x128xf32> to vector<8x32xf32>
    %53 = arith.negf %52 : vector<8x32xf32>
    %54 = math.exp %53 : vector<8x32xf32>
    %cst_28 = arith.constant 1.000000e+00 : f32
    %55 = vector.broadcast %cst_28 : f32 to vector<8x32xf32>
    %56 = arith.addf %55, %54 : vector<8x32xf32>
    %57 = arith.divf %55, %56 : vector<8x32xf32>
    %58 = vector.extract_strided_slice %45 {offsets = [0, 64], sizes = [8, 32], strides = [1, 1]} : vector<8x128xf32> to vector<8x32xf32>
    %59 = math.tanh %58 : vector<8x32xf32>
    %60 = vector.extract_strided_slice %45 {offsets = [0, 96], sizes = [8, 32], strides = [1, 1]} : vector<8x128xf32> to vector<8x32xf32>
    %61 = arith.negf %60 : vector<8x32xf32>
    %62 = math.exp %61 : vector<8x32xf32>
    %cst_29 = arith.constant 1.000000e+00 : f32
    %63 = vector.broadcast %cst_29 : f32 to vector<8x32xf32>
    %64 = arith.addf %63, %62 : vector<8x32xf32>
    %65 = arith.divf %63, %64 : vector<8x32xf32>
    %66 = arith.mulf %57, %38 : vector<8x32xf32>
    %67 = arith.mulf %51, %59 : vector<8x32xf32>
    %68 = arith.addf %66, %67 : vector<8x32xf32>
    %69 = math.tanh %68 : vector<8x32xf32>
    %70 = arith.mulf %65, %69 : vector<8x32xf32>
    %71 = arith.index_cast %40 : i32 to index
    %c0_30 = arith.constant 0 : index
    %72 = vector.load %arg16[%71, %c0_30] : memref<64x32xf32, #tpu.memory_space<vmem>>, vector<8x32xf32>
    tpu.vector_store %arg16[%71, %c0_30], %70 {strides = array<i32>} : memref<64x32xf32, #tpu.memory_space<vmem>>, vector<8x32xf32>,
    %c1_i32 = arith.constant 1 : i32
    %c8_i32_31 = arith.constant 8 : i32
    %73 = arith.muli %c1_i32, %c8_i32_31 : i32
    %74 = tpu.assume_multiple %73, 8 : i32
    %75 = arith.index_cast %74 : i32 to index
    %c0_32 = arith.constant 0 : index
    %76 = vector.load %arg14[%75, %c0_32] : memref<64x128xf32, #tpu.memory_space<vmem>>, vector<8x128xf32>
    %c0_33 = arith.constant 0 : index
    %c0_34 = arith.constant 0 : index
    %77 = vector.load %arg15[%c0_33, %c0_34] : memref<32x128xf32, #tpu.memory_space<vmem>>, vector<32x128xf32>
    %cst_35 = arith.constant dense<0.000000e+00> : vector<8x128xf32>
    %78 = tpu.matmul %70, %77, %cst_35 {dimension_numbers = #tpu.dot_dimension_numbers<[1], [0], [0], [1], [0, 0, 1, 1], [], []>} : vector<8x32xf32>, vector<32x128xf32>, vector<8x128xf32> -> vector<8x128xf32>
    %79 = arith.addf %76, %78 : vector<8x128xf32>
    %80 = vector.extract_strided_slice %79 {offsets = [0, 0], sizes = [8, 32], strides = [1, 1]} : vector<8x128xf32> to vector<8x32xf32>
    %81 = arith.negf %80 : vector<8x32xf32>
    %82 = math.exp %81 : vector<8x32xf32>
    %cst_36 = arith.constant 1.000000e+00 : f32
    %83 = vector.broadcast %cst_36 : f32 to vector<8x32xf32>
    %84 = arith.addf %83, %82 : vector<8x32xf32>
    %85 = arith.divf %83, %84 : vector<8x32xf32>
    %86 = vector.extract_strided_slice %79 {offsets = [0, 32], sizes = [8, 32], strides = [1, 1]} : vector<8x128xf32> to vector<8x32xf32>
    %87 = arith.negf %86 : vector<8x32xf32>
    %88 = math.exp %87 : vector<8x32xf32>
    %cst_37 = arith.constant 1.000000e+00 : f32
    %89 = vector.broadcast %cst_37 : f32 to vector<8x32xf32>
    %90 = arith.addf %89, %88 : vector<8x32xf32>
    %91 = arith.divf %89, %90 : vector<8x32xf32>
    %92 = vector.extract_strided_slice %79 {offsets = [0, 64], sizes = [8, 32], strides = [1, 1]} : vector<8x128xf32> to vector<8x32xf32>
    %93 = math.tanh %92 : vector<8x32xf32>
    %94 = vector.extract_strided_slice %79 {offsets = [0, 96], sizes = [8, 32], strides = [1, 1]} : vector<8x128xf32> to vector<8x32xf32>
    %95 = arith.negf %94 : vector<8x32xf32>
    %96 = math.exp %95 : vector<8x32xf32>
    %cst_38 = arith.constant 1.000000e+00 : f32
    %97 = vector.broadcast %cst_38 : f32 to vector<8x32xf32>
    %98 = arith.addf %97, %96 : vector<8x32xf32>
    %99 = arith.divf %97, %98 : vector<8x32xf32>
    %100 = arith.mulf %91, %68 : vector<8x32xf32>
    %101 = arith.mulf %85, %93 : vector<8x32xf32>
    %102 = arith.addf %100, %101 : vector<8x32xf32>
    %103 = math.tanh %102 : vector<8x32xf32>
    %104 = arith.mulf %99, %103 : vector<8x32xf32>
    %105 = arith.index_cast %74 : i32 to index
    %c0_39 = arith.constant 0 : index
    %106 = vector.load %arg16[%105, %c0_39] : memref<64x32xf32, #tpu.memory_space<vmem>>, vector<8x32xf32>
    tpu.vector_store %arg16[%105, %c0_39], %104 {strides = array<i32>} : memref<64x32xf32, #tpu.memory_space<vmem>>, vector<8x32xf32>,
    %c2_i32 = arith.constant 2 : i32
    %c8_i32_40 = arith.constant 8 : i32
    %107 = arith.muli %c2_i32, %c8_i32_40 : i32
    %108 = tpu.assume_multiple %107, 8 : i32
    %109 = arith.index_cast %108 : i32 to index
    %c0_41 = arith.constant 0 : index
    %110 = vector.load %arg14[%109, %c0_41] : memref<64x128xf32, #tpu.memory_space<vmem>>, vector<8x128xf32>
    %c0_42 = arith.constant 0 : index
    %c0_43 = arith.constant 0 : index
    %111 = vector.load %arg15[%c0_42, %c0_43] : memref<32x128xf32, #tpu.memory_space<vmem>>, vector<32x128xf32>
    %cst_44 = arith.constant dense<0.000000e+00> : vector<8x128xf32>
    %112 = tpu.matmul %104, %111, %cst_44 {dimension_numbers = #tpu.dot_dimension_numbers<[1], [0], [0], [1], [0, 0, 1, 1], [], []>} : vector<8x32xf32>, vector<32x128xf32>, vector<8x128xf32> -> vector<8x128xf32>
    %113 = arith.addf %110, %112 : vector<8x128xf32>
    %114 = vector.extract_strided_slice %113 {offsets = [0, 0], sizes = [8, 32], strides = [1, 1]} : vector<8x128xf32> to vector<8x32xf32>
    %115 = arith.negf %114 : vector<8x32xf32>
    %116 = math.exp %115 : vector<8x32xf32>
    %cst_45 = arith.constant 1.000000e+00 : f32
    %117 = vector.broadcast %cst_45 : f32 to vector<8x32xf32>
    %118 = arith.addf %117, %116 : vector<8x32xf32>
    %119 = arith.divf %117, %118 : vector<8x32xf32>
    %120 = vector.extract_strided_slice %113 {offsets = [0, 32], sizes = [8, 32], strides = [1, 1]} : vector<8x128xf32> to vector<8x32xf32>
    %121 = arith.negf %120 : vector<8x32xf32>
    %122 = math.exp %121 : vector<8x32xf32>
    %cst_46 = arith.constant 1.000000e+00 : f32
    %123 = vector.broadcast %cst_46 : f32 to vector<8x32xf32>
    %124 = arith.addf %123, %122 : vector<8x32xf32>
    %125 = arith.divf %123, %124 : vector<8x32xf32>
    %126 = vector.extract_strided_slice %113 {offsets = [0, 64], sizes = [8, 32], strides = [1, 1]} : vector<8x128xf32> to vector<8x32xf32>
    %127 = math.tanh %126 : vector<8x32xf32>
    %128 = vector.extract_strided_slice %113 {offsets = [0, 96], sizes = [8, 32], strides = [1, 1]} : vector<8x128xf32> to vector<8x32xf32>
    %129 = arith.negf %128 : vector<8x32xf32>
    %130 = math.exp %129 : vector<8x32xf32>
    %cst_47 = arith.constant 1.000000e+00 : f32
    %131 = vector.broadcast %cst_47 : f32 to vector<8x32xf32>
    %132 = arith.addf %131, %130 : vector<8x32xf32>
    %133 = arith.divf %131, %132 : vector<8x32xf32>
    %134 = arith.mulf %125, %102 : vector<8x32xf32>
    %135 = arith.mulf %119, %127 : vector<8x32xf32>
    %136 = arith.addf %134, %135 : vector<8x32xf32>
    %137 = math.tanh %136 : vector<8x32xf32>
    %138 = arith.mulf %133, %137 : vector<8x32xf32>
    %139 = arith.index_cast %108 : i32 to index
    %c0_48 = arith.constant 0 : index
    %140 = vector.load %arg16[%139, %c0_48] : memref<64x32xf32, #tpu.memory_space<vmem>>, vector<8x32xf32>
    tpu.vector_store %arg16[%139, %c0_48], %138 {strides = array<i32>} : memref<64x32xf32, #tpu.memory_space<vmem>>, vector<8x32xf32>,
    %c3_i32 = arith.constant 3 : i32
    %c8_i32_49 = arith.constant 8 : i32
    %141 = arith.muli %c3_i32, %c8_i32_49 : i32
    %142 = tpu.assume_multiple %141, 8 : i32
    %143 = arith.index_cast %142 : i32 to index
    %c0_50 = arith.constant 0 : index
    %144 = vector.load %arg14[%143, %c0_50] : memref<64x128xf32, #tpu.memory_space<vmem>>, vector<8x128xf32>
    %c0_51 = arith.constant 0 : index
    %c0_52 = arith.constant 0 : index
    %145 = vector.load %arg15[%c0_51, %c0_52] : memref<32x128xf32, #tpu.memory_space<vmem>>, vector<32x128xf32>
    %cst_53 = arith.constant dense<0.000000e+00> : vector<8x128xf32>
    %146 = tpu.matmul %138, %145, %cst_53 {dimension_numbers = #tpu.dot_dimension_numbers<[1], [0], [0], [1], [0, 0, 1, 1], [], []>} : vector<8x32xf32>, vector<32x128xf32>, vector<8x128xf32> -> vector<8x128xf32>
    %147 = arith.addf %144, %146 : vector<8x128xf32>
    %148 = vector.extract_strided_slice %147 {offsets = [0, 0], sizes = [8, 32], strides = [1, 1]} : vector<8x128xf32> to vector<8x32xf32>
    %149 = arith.negf %148 : vector<8x32xf32>
    %150 = math.exp %149 : vector<8x32xf32>
    %cst_54 = arith.constant 1.000000e+00 : f32
    %151 = vector.broadcast %cst_54 : f32 to vector<8x32xf32>
    %152 = arith.addf %151, %150 : vector<8x32xf32>
    %153 = arith.divf %151, %152 : vector<8x32xf32>
    %154 = vector.extract_strided_slice %147 {offsets = [0, 32], sizes = [8, 32], strides = [1, 1]} : vector<8x128xf32> to vector<8x32xf32>
    %155 = arith.negf %154 : vector<8x32xf32>
    %156 = math.exp %155 : vector<8x32xf32>
    %cst_55 = arith.constant 1.000000e+00 : f32
    %157 = vector.broadcast %cst_55 : f32 to vector<8x32xf32>
    %158 = arith.addf %157, %156 : vector<8x32xf32>
    %159 = arith.divf %157, %158 : vector<8x32xf32>
    %160 = vector.extract_strided_slice %147 {offsets = [0, 64], sizes = [8, 32], strides = [1, 1]} : vector<8x128xf32> to vector<8x32xf32>
    %161 = math.tanh %160 : vector<8x32xf32>
    %162 = vector.extract_strided_slice %147 {offsets = [0, 96], sizes = [8, 32], strides = [1, 1]} : vector<8x128xf32> to vector<8x32xf32>
    %163 = arith.negf %162 : vector<8x32xf32>
    %164 = math.exp %163 : vector<8x32xf32>
    %cst_56 = arith.constant 1.000000e+00 : f32
    %165 = vector.broadcast %cst_56 : f32 to vector<8x32xf32>
    %166 = arith.addf %165, %164 : vector<8x32xf32>
    %167 = arith.divf %165, %166 : vector<8x32xf32>
    %168 = arith.mulf %159, %136 : vector<8x32xf32>
    %169 = arith.mulf %153, %161 : vector<8x32xf32>
    %170 = arith.addf %168, %169 : vector<8x32xf32>
    %171 = math.tanh %170 : vector<8x32xf32>
    %172 = arith.mulf %167, %171 : vector<8x32xf32>
    %173 = arith.index_cast %142 : i32 to index
    %c0_57 = arith.constant 0 : index
    %174 = vector.load %arg16[%173, %c0_57] : memref<64x32xf32, #tpu.memory_space<vmem>>, vector<8x32xf32>
    tpu.vector_store %arg16[%173, %c0_57], %172 {strides = array<i32>} : memref<64x32xf32, #tpu.memory_space<vmem>>, vector<8x32xf32>,
    %c4_i32 = arith.constant 4 : i32
    %c8_i32_58 = arith.constant 8 : i32
    %175 = arith.muli %c4_i32, %c8_i32_58 : i32
    %176 = tpu.assume_multiple %175, 8 : i32
    %177 = arith.index_cast %176 : i32 to index
    %c0_59 = arith.constant 0 : index
    %178 = vector.load %arg14[%177, %c0_59] : memref<64x128xf32, #tpu.memory_space<vmem>>, vector<8x128xf32>
    %c0_60 = arith.constant 0 : index
    %c0_61 = arith.constant 0 : index
    %179 = vector.load %arg15[%c0_60, %c0_61] : memref<32x128xf32, #tpu.memory_space<vmem>>, vector<32x128xf32>
    %cst_62 = arith.constant dense<0.000000e+00> : vector<8x128xf32>
    %180 = tpu.matmul %172, %179, %cst_62 {dimension_numbers = #tpu.dot_dimension_numbers<[1], [0], [0], [1], [0, 0, 1, 1], [], []>} : vector<8x32xf32>, vector<32x128xf32>, vector<8x128xf32> -> vector<8x128xf32>
    %181 = arith.addf %178, %180 : vector<8x128xf32>
    %182 = vector.extract_strided_slice %181 {offsets = [0, 0], sizes = [8, 32], strides = [1, 1]} : vector<8x128xf32> to vector<8x32xf32>
    %183 = arith.negf %182 : vector<8x32xf32>
    %184 = math.exp %183 : vector<8x32xf32>
    %cst_63 = arith.constant 1.000000e+00 : f32
    %185 = vector.broadcast %cst_63 : f32 to vector<8x32xf32>
    %186 = arith.addf %185, %184 : vector<8x32xf32>
    %187 = arith.divf %185, %186 : vector<8x32xf32>
    %188 = vector.extract_strided_slice %181 {offsets = [0, 32], sizes = [8, 32], strides = [1, 1]} : vector<8x128xf32> to vector<8x32xf32>
    %189 = arith.negf %188 : vector<8x32xf32>
    %190 = math.exp %189 : vector<8x32xf32>
    %cst_64 = arith.constant 1.000000e+00 : f32
    %191 = vector.broadcast %cst_64 : f32 to vector<8x32xf32>
    %192 = arith.addf %191, %190 : vector<8x32xf32>
    %193 = arith.divf %191, %192 : vector<8x32xf32>
    %194 = vector.extract_strided_slice %181 {offsets = [0, 64], sizes = [8, 32], strides = [1, 1]} : vector<8x128xf32> to vector<8x32xf32>
    %195 = math.tanh %194 : vector<8x32xf32>
    %196 = vector.extract_strided_slice %181 {offsets = [0, 96], sizes = [8, 32], strides = [1, 1]} : vector<8x128xf32> to vector<8x32xf32>
    %197 = arith.negf %196 : vector<8x32xf32>
    %198 = math.exp %197 : vector<8x32xf32>
    %cst_65 = arith.constant 1.000000e+00 : f32
    %199 = vector.broadcast %cst_65 : f32 to vector<8x32xf32>
    %200 = arith.addf %199, %198 : vector<8x32xf32>
    %201 = arith.divf %199, %200 : vector<8x32xf32>
    %202 = arith.mulf %193, %170 : vector<8x32xf32>
    %203 = arith.mulf %187, %195 : vector<8x32xf32>
    %204 = arith.addf %202, %203 : vector<8x32xf32>
    %205 = math.tanh %204 : vector<8x32xf32>
    %206 = arith.mulf %201, %205 : vector<8x32xf32>
    %207 = arith.index_cast %176 : i32 to index
    %c0_66 = arith.constant 0 : index
    %208 = vector.load %arg16[%207, %c0_66] : memref<64x32xf32, #tpu.memory_space<vmem>>, vector<8x32xf32>
    tpu.vector_store %arg16[%207, %c0_66], %206 {strides = array<i32>} : memref<64x32xf32, #tpu.memory_space<vmem>>, vector<8x32xf32>,
    %c5_i32 = arith.constant 5 : i32
    %c8_i32_67 = arith.constant 8 : i32
    %209 = arith.muli %c5_i32, %c8_i32_67 : i32
    %210 = tpu.assume_multiple %209, 8 : i32
    %211 = arith.index_cast %210 : i32 to index
    %c0_68 = arith.constant 0 : index
    %212 = vector.load %arg14[%211, %c0_68] : memref<64x128xf32, #tpu.memory_space<vmem>>, vector<8x128xf32>
    %c0_69 = arith.constant 0 : index
    %c0_70 = arith.constant 0 : index
    %213 = vector.load %arg15[%c0_69, %c0_70] : memref<32x128xf32, #tpu.memory_space<vmem>>, vector<32x128xf32>
    %cst_71 = arith.constant dense<0.000000e+00> : vector<8x128xf32>
    %214 = tpu.matmul %206, %213, %cst_71 {dimension_numbers = #tpu.dot_dimension_numbers<[1], [0], [0], [1], [0, 0, 1, 1], [], []>} : vector<8x32xf32>, vector<32x128xf32>, vector<8x128xf32> -> vector<8x128xf32>
    %215 = arith.addf %212, %214 : vector<8x128xf32>
    %216 = vector.extract_strided_slice %215 {offsets = [0, 0], sizes = [8, 32], strides = [1, 1]} : vector<8x128xf32> to vector<8x32xf32>
    %217 = arith.negf %216 : vector<8x32xf32>
    %218 = math.exp %217 : vector<8x32xf32>
    %cst_72 = arith.constant 1.000000e+00 : f32
    %219 = vector.broadcast %cst_72 : f32 to vector<8x32xf32>
    %220 = arith.addf %219, %218 : vector<8x32xf32>
    %221 = arith.divf %219, %220 : vector<8x32xf32>
    %222 = vector.extract_strided_slice %215 {offsets = [0, 32], sizes = [8, 32], strides = [1, 1]} : vector<8x128xf32> to vector<8x32xf32>
    %223 = arith.negf %222 : vector<8x32xf32>
    %224 = math.exp %223 : vector<8x32xf32>
    %cst_73 = arith.constant 1.000000e+00 : f32
    %225 = vector.broadcast %cst_73 : f32 to vector<8x32xf32>
    %226 = arith.addf %225, %224 : vector<8x32xf32>
    %227 = arith.divf %225, %226 : vector<8x32xf32>
    %228 = vector.extract_strided_slice %215 {offsets = [0, 64], sizes = [8, 32], strides = [1, 1]} : vector<8x128xf32> to vector<8x32xf32>
    %229 = math.tanh %228 : vector<8x32xf32>
    %230 = vector.extract_strided_slice %215 {offsets = [0, 96], sizes = [8, 32], strides = [1, 1]} : vector<8x128xf32> to vector<8x32xf32>
    %231 = arith.negf %230 : vector<8x32xf32>
    %232 = math.exp %231 : vector<8x32xf32>
    %cst_74 = arith.constant 1.000000e+00 : f32
    %233 = vector.broadcast %cst_74 : f32 to vector<8x32xf32>
    %234 = arith.addf %233, %232 : vector<8x32xf32>
    %235 = arith.divf %233, %234 : vector<8x32xf32>
    %236 = arith.mulf %227, %204 : vector<8x32xf32>
    %237 = arith.mulf %221, %229 : vector<8x32xf32>
    %238 = arith.addf %236, %237 : vector<8x32xf32>
    %239 = math.tanh %238 : vector<8x32xf32>
    %240 = arith.mulf %235, %239 : vector<8x32xf32>
    %241 = arith.index_cast %210 : i32 to index
    %c0_75 = arith.constant 0 : index
    %242 = vector.load %arg16[%241, %c0_75] : memref<64x32xf32, #tpu.memory_space<vmem>>, vector<8x32xf32>
    tpu.vector_store %arg16[%241, %c0_75], %240 {strides = array<i32>} : memref<64x32xf32, #tpu.memory_space<vmem>>, vector<8x32xf32>,
    %c6_i32 = arith.constant 6 : i32
    %c8_i32_76 = arith.constant 8 : i32
    %243 = arith.muli %c6_i32, %c8_i32_76 : i32
    %244 = tpu.assume_multiple %243, 8 : i32
    %245 = arith.index_cast %244 : i32 to index
    %c0_77 = arith.constant 0 : index
    %246 = vector.load %arg14[%245, %c0_77] : memref<64x128xf32, #tpu.memory_space<vmem>>, vector<8x128xf32>
    %c0_78 = arith.constant 0 : index
    %c0_79 = arith.constant 0 : index
    %247 = vector.load %arg15[%c0_78, %c0_79] : memref<32x128xf32, #tpu.memory_space<vmem>>, vector<32x128xf32>
    %cst_80 = arith.constant dense<0.000000e+00> : vector<8x128xf32>
    %248 = tpu.matmul %240, %247, %cst_80 {dimension_numbers = #tpu.dot_dimension_numbers<[1], [0], [0], [1], [0, 0, 1, 1], [], []>} : vector<8x32xf32>, vector<32x128xf32>, vector<8x128xf32> -> vector<8x128xf32>
    %249 = arith.addf %246, %248 : vector<8x128xf32>
    %250 = vector.extract_strided_slice %249 {offsets = [0, 0], sizes = [8, 32], strides = [1, 1]} : vector<8x128xf32> to vector<8x32xf32>
    %251 = arith.negf %250 : vector<8x32xf32>
    %252 = math.exp %251 : vector<8x32xf32>
    %cst_81 = arith.constant 1.000000e+00 : f32
    %253 = vector.broadcast %cst_81 : f32 to vector<8x32xf32>
    %254 = arith.addf %253, %252 : vector<8x32xf32>
    %255 = arith.divf %253, %254 : vector<8x32xf32>
    %256 = vector.extract_strided_slice %249 {offsets = [0, 32], sizes = [8, 32], strides = [1, 1]} : vector<8x128xf32> to vector<8x32xf32>
    %257 = arith.negf %256 : vector<8x32xf32>
    %258 = math.exp %257 : vector<8x32xf32>
    %cst_82 = arith.constant 1.000000e+00 : f32
    %259 = vector.broadcast %cst_82 : f32 to vector<8x32xf32>
    %260 = arith.addf %259, %258 : vector<8x32xf32>
    %261 = arith.divf %259, %260 : vector<8x32xf32>
    %262 = vector.extract_strided_slice %249 {offsets = [0, 64], sizes = [8, 32], strides = [1, 1]} : vector<8x128xf32> to vector<8x32xf32>
    %263 = math.tanh %262 : vector<8x32xf32>
    %264 = vector.extract_strided_slice %249 {offsets = [0, 96], sizes = [8, 32], strides = [1, 1]} : vector<8x128xf32> to vector<8x32xf32>
    %265 = arith.negf %264 : vector<8x32xf32>
    %266 = math.exp %265 : vector<8x32xf32>
    %cst_83 = arith.constant 1.000000e+00 : f32
    %267 = vector.broadcast %cst_83 : f32 to vector<8x32xf32>
    %268 = arith.addf %267, %266 : vector<8x32xf32>
    %269 = arith.divf %267, %268 : vector<8x32xf32>
    %270 = arith.mulf %261, %238 : vector<8x32xf32>
    %271 = arith.mulf %255, %263 : vector<8x32xf32>
    %272 = arith.addf %270, %271 : vector<8x32xf32>
    %273 = math.tanh %272 : vector<8x32xf32>
    %274 = arith.mulf %269, %273 : vector<8x32xf32>
    %275 = arith.index_cast %244 : i32 to index
    %c0_84 = arith.constant 0 : index
    %276 = vector.load %arg16[%275, %c0_84] : memref<64x32xf32, #tpu.memory_space<vmem>>, vector<8x32xf32>
    tpu.vector_store %arg16[%275, %c0_84], %274 {strides = array<i32>} : memref<64x32xf32, #tpu.memory_space<vmem>>, vector<8x32xf32>,
    %c7_i32 = arith.constant 7 : i32
    %c8_i32_85 = arith.constant 8 : i32
    %277 = arith.muli %c7_i32, %c8_i32_85 : i32
    %278 = tpu.assume_multiple %277, 8 : i32
    %279 = arith.index_cast %278 : i32 to index
    %c0_86 = arith.constant 0 : index
    %280 = vector.load %arg14[%279, %c0_86] : memref<64x128xf32, #tpu.memory_space<vmem>>, vector<8x128xf32>
    %c0_87 = arith.constant 0 : index
    %c0_88 = arith.constant 0 : index
    %281 = vector.load %arg15[%c0_87, %c0_88] : memref<32x128xf32, #tpu.memory_space<vmem>>, vector<32x128xf32>
    %cst_89 = arith.constant dense<0.000000e+00> : vector<8x128xf32>
    %282 = tpu.matmul %274, %281, %cst_89 {dimension_numbers = #tpu.dot_dimension_numbers<[1], [0], [0], [1], [0, 0, 1, 1], [], []>} : vector<8x32xf32>, vector<32x128xf32>, vector<8x128xf32> -> vector<8x128xf32>
    %283 = arith.addf %280, %282 : vector<8x128xf32>
    %284 = vector.extract_strided_slice %283 {offsets = [0, 0], sizes = [8, 32], strides = [1, 1]} : vector<8x128xf32> to vector<8x32xf32>
    %285 = arith.negf %284 : vector<8x32xf32>
    %286 = math.exp %285 : vector<8x32xf32>
    %cst_90 = arith.constant 1.000000e+00 : f32
    %287 = vector.broadcast %cst_90 : f32 to vector<8x32xf32>
    %288 = arith.addf %287, %286 : vector<8x32xf32>
    %289 = arith.divf %287, %288 : vector<8x32xf32>
    %290 = vector.extract_strided_slice %283 {offsets = [0, 32], sizes = [8, 32], strides = [1, 1]} : vector<8x128xf32> to vector<8x32xf32>
    %291 = arith.negf %290 : vector<8x32xf32>
    %292 = math.exp %291 : vector<8x32xf32>
    %cst_91 = arith.constant 1.000000e+00 : f32
    %293 = vector.broadcast %cst_91 : f32 to vector<8x32xf32>
    %294 = arith.addf %293, %292 : vector<8x32xf32>
    %295 = arith.divf %293, %294 : vector<8x32xf32>
    %296 = vector.extract_strided_slice %283 {offsets = [0, 64], sizes = [8, 32], strides = [1, 1]} : vector<8x128xf32> to vector<8x32xf32>
    %297 = math.tanh %296 : vector<8x32xf32>
    %298 = vector.extract_strided_slice %283 {offsets = [0, 96], sizes = [8, 32], strides = [1, 1]} : vector<8x128xf32> to vector<8x32xf32>
    %299 = arith.negf %298 : vector<8x32xf32>
    %300 = math.exp %299 : vector<8x32xf32>
    %cst_92 = arith.constant 1.000000e+00 : f32
    %301 = vector.broadcast %cst_92 : f32 to vector<8x32xf32>
    %302 = arith.addf %301, %300 : vector<8x32xf32>
    %303 = arith.divf %301, %302 : vector<8x32xf32>
    %304 = arith.mulf %295, %272 : vector<8x32xf32>
    %305 = arith.mulf %289, %297 : vector<8x32xf32>
    %306 = arith.addf %304, %305 : vector<8x32xf32>
    %307 = math.tanh %306 : vector<8x32xf32>
    %308 = arith.mulf %303, %307 : vector<8x32xf32>
    %309 = arith.index_cast %278 : i32 to index
    %c0_93 = arith.constant 0 : index
    %310 = vector.load %arg16[%309, %c0_93] : memref<64x32xf32, #tpu.memory_space<vmem>>, vector<8x32xf32>
    tpu.vector_store %arg16[%309, %c0_93], %308 {strides = array<i32>} : memref<64x32xf32, #tpu.memory_space<vmem>>, vector<8x32xf32>,
    %c8_i32_94 = arith.constant 8 : i32
    %c0_95 = arith.constant 0 : index
    %c0_96 = arith.constant 0 : index
    %311 = vector.load %arg16[%c0_95, %c0_96] : memref<64x32xf32, #tpu.memory_space<vmem>>, vector<64x32xf32>
    %c0_97 = arith.constant 0 : index
    %c0_98 = arith.constant 0 : index
    %312 = vector.load %arg6[%c0_97, %c0_98] : memref<32x128xbf16, #tpu.memory_space<vmem>>, vector<32x128xbf16>
    %313 = arith.extf %312 : vector<32x128xbf16> to vector<32x128xf32>
    %cst_99 = arith.constant dense<0.000000e+00> : vector<64x128xf32>
    %314 = tpu.matmul %311, %313, %cst_99 {dimension_numbers = #tpu.dot_dimension_numbers<[1], [0], [0], [1], [0, 0, 1, 1], [], []>} : vector<64x32xf32>, vector<32x128xf32>, vector<64x128xf32> -> vector<64x128xf32>
    %c0_100 = arith.constant 0 : index
    %c0_101 = arith.constant 0 : index
    %315 = vector.load %arg8[%c0_100, %c0_101] : memref<1x128xf32, #tpu.memory_space<vmem>>, vector<1x128xf32>
    %316 = vector.broadcast %315 : vector<1x128xf32> to vector<64x128xf32>
    %317 = arith.addf %314, %316 : vector<64x128xf32>
    %c0_102 = arith.constant 0 : index
    %c0_103 = arith.constant 0 : index
    %318 = vector.load %arg14[%c0_102, %c0_103] : memref<64x128xf32, #tpu.memory_space<vmem>>, vector<64x128xf32>
    tpu.vector_store %arg14[%c0_102, %c0_103], %317 {strides = array<i32>} : memref<64x128xf32, #tpu.memory_space<vmem>>, vector<64x128xf32>,
    %c0_104 = arith.constant 0 : index
    %c0_105 = arith.constant 0 : index
    %319 = vector.load %arg7[%c0_104, %c0_105] : memref<32x128xbf16, #tpu.memory_space<vmem>>, vector<32x128xbf16>
    %320 = arith.extf %319 : vector<32x128xbf16> to vector<32x128xf32>
    %c0_106 = arith.constant 0 : index
    %c0_107 = arith.constant 0 : index
    %321 = vector.load %arg15[%c0_106, %c0_107] : memref<32x128xf32, #tpu.memory_space<vmem>>, vector<32x128xf32>
    tpu.vector_store %arg15[%c0_106, %c0_107], %320 {strides = array<i32>} : memref<32x128xf32, #tpu.memory_space<vmem>>, vector<32x128xf32>,
    %cst_108 = arith.constant 0.000000e+00 : f32
    %322 = vector.broadcast %cst_108 : f32 to vector<8x32xf32>
    %cst_109 = arith.constant 0.000000e+00 : f32
    %323 = vector.broadcast %cst_109 : f32 to vector<8x32xf32>
    %c0_i32_110 = arith.constant 0 : i32
    %c8_i32_111 = arith.constant 8 : i32
    %324 = arith.muli %c0_i32_110, %c8_i32_111 : i32
    %325 = tpu.assume_multiple %324, 8 : i32
    %326 = arith.index_cast %325 : i32 to index
    %c0_112 = arith.constant 0 : index
    %327 = vector.load %arg14[%326, %c0_112] : memref<64x128xf32, #tpu.memory_space<vmem>>, vector<8x128xf32>
    %c0_113 = arith.constant 0 : index
    %c0_114 = arith.constant 0 : index
    %328 = vector.load %arg15[%c0_113, %c0_114] : memref<32x128xf32, #tpu.memory_space<vmem>>, vector<32x128xf32>
    %cst_115 = arith.constant dense<0.000000e+00> : vector<8x128xf32>
    %329 = tpu.matmul %322, %328, %cst_115 {dimension_numbers = #tpu.dot_dimension_numbers<[1], [0], [0], [1], [0, 0, 1, 1], [], []>} : vector<8x32xf32>, vector<32x128xf32>, vector<8x128xf32> -> vector<8x128xf32>
    %330 = arith.addf %327, %329 : vector<8x128xf32>
    %331 = vector.extract_strided_slice %330 {offsets = [0, 0], sizes = [8, 32], strides = [1, 1]} : vector<8x128xf32> to vector<8x32xf32>
    %332 = arith.negf %331 : vector<8x32xf32>
    %333 = math.exp %332 : vector<8x32xf32>
    %cst_116 = arith.constant 1.000000e+00 : f32
    %334 = vector.broadcast %cst_116 : f32 to vector<8x32xf32>
    %335 = arith.addf %334, %333 : vector<8x32xf32>
    %336 = arith.divf %334, %335 : vector<8x32xf32>
    %337 = vector.extract_strided_slice %330 {offsets = [0, 32], sizes = [8, 32], strides = [1, 1]} : vector<8x128xf32> to vector<8x32xf32>
    %338 = arith.negf %337 : vector<8x32xf32>
    %339 = math.exp %338 : vector<8x32xf32>
    %cst_117 = arith.constant 1.000000e+00 : f32
    %340 = vector.broadcast %cst_117 : f32 to vector<8x32xf32>
    %341 = arith.addf %340, %339 : vector<8x32xf32>
    %342 = arith.divf %340, %341 : vector<8x32xf32>
    %343 = vector.extract_strided_slice %330 {offsets = [0, 64], sizes = [8, 32], strides = [1, 1]} : vector<8x128xf32> to vector<8x32xf32>
    %344 = math.tanh %343 : vector<8x32xf32>
    %345 = vector.extract_strided_slice %330 {offsets = [0, 96], sizes = [8, 32], strides = [1, 1]} : vector<8x128xf32> to vector<8x32xf32>
    %346 = arith.negf %345 : vector<8x32xf32>
    %347 = math.exp %346 : vector<8x32xf32>
    %cst_118 = arith.constant 1.000000e+00 : f32
    %348 = vector.broadcast %cst_118 : f32 to vector<8x32xf32>
    %349 = arith.addf %348, %347 : vector<8x32xf32>
    %350 = arith.divf %348, %349 : vector<8x32xf32>
    %351 = arith.mulf %342, %323 : vector<8x32xf32>
    %352 = arith.mulf %336, %344 : vector<8x32xf32>
    %353 = arith.addf %351, %352 : vector<8x32xf32>
    %354 = math.tanh %353 : vector<8x32xf32>
    %355 = arith.mulf %350, %354 : vector<8x32xf32>
    %c1_i32_119 = arith.constant 1 : i32
    %c8_i32_120 = arith.constant 8 : i32
    %356 = arith.muli %c1_i32_119, %c8_i32_120 : i32
    %357 = tpu.assume_multiple %356, 8 : i32
    %358 = arith.index_cast %357 : i32 to index
    %c0_121 = arith.constant 0 : index
    %359 = vector.load %arg14[%358, %c0_121] : memref<64x128xf32, #tpu.memory_space<vmem>>, vector<8x128xf32>
    %c0_122 = arith.constant 0 : index
    %c0_123 = arith.constant 0 : index
    %360 = vector.load %arg15[%c0_122, %c0_123] : memref<32x128xf32, #tpu.memory_space<vmem>>, vector<32x128xf32>
    %cst_124 = arith.constant dense<0.000000e+00> : vector<8x128xf32>
    %361 = tpu.matmul %355, %360, %cst_124 {dimension_numbers = #tpu.dot_dimension_numbers<[1], [0], [0], [1], [0, 0, 1, 1], [], []>} : vector<8x32xf32>, vector<32x128xf32>, vector<8x128xf32> -> vector<8x128xf32>
    %362 = arith.addf %359, %361 : vector<8x128xf32>
    %363 = vector.extract_strided_slice %362 {offsets = [0, 0], sizes = [8, 32], strides = [1, 1]} : vector<8x128xf32> to vector<8x32xf32>
    %364 = arith.negf %363 : vector<8x32xf32>
    %365 = math.exp %364 : vector<8x32xf32>
    %cst_125 = arith.constant 1.000000e+00 : f32
    %366 = vector.broadcast %cst_125 : f32 to vector<8x32xf32>
    %367 = arith.addf %366, %365 : vector<8x32xf32>
    %368 = arith.divf %366, %367 : vector<8x32xf32>
    %369 = vector.extract_strided_slice %362 {offsets = [0, 32], sizes = [8, 32], strides = [1, 1]} : vector<8x128xf32> to vector<8x32xf32>
    %370 = arith.negf %369 : vector<8x32xf32>
    %371 = math.exp %370 : vector<8x32xf32>
    %cst_126 = arith.constant 1.000000e+00 : f32
    %372 = vector.broadcast %cst_126 : f32 to vector<8x32xf32>
    %373 = arith.addf %372, %371 : vector<8x32xf32>
    %374 = arith.divf %372, %373 : vector<8x32xf32>
    %375 = vector.extract_strided_slice %362 {offsets = [0, 64], sizes = [8, 32], strides = [1, 1]} : vector<8x128xf32> to vector<8x32xf32>
    %376 = math.tanh %375 : vector<8x32xf32>
    %377 = vector.extract_strided_slice %362 {offsets = [0, 96], sizes = [8, 32], strides = [1, 1]} : vector<8x128xf32> to vector<8x32xf32>
    %378 = arith.negf %377 : vector<8x32xf32>
    %379 = math.exp %378 : vector<8x32xf32>
    %cst_127 = arith.constant 1.000000e+00 : f32
    %380 = vector.broadcast %cst_127 : f32 to vector<8x32xf32>
    %381 = arith.addf %380, %379 : vector<8x32xf32>
    %382 = arith.divf %380, %381 : vector<8x32xf32>
    %383 = arith.mulf %374, %353 : vector<8x32xf32>
    %384 = arith.mulf %368, %376 : vector<8x32xf32>
    %385 = arith.addf %383, %384 : vector<8x32xf32>
    %386 = math.tanh %385 : vector<8x32xf32>
    %387 = arith.mulf %382, %386 : vector<8x32xf32>
    %c2_i32_128 = arith.constant 2 : i32
    %c8_i32_129 = arith.constant 8 : i32
    %388 = arith.muli %c2_i32_128, %c8_i32_129 : i32
    %389 = tpu.assume_multiple %388, 8 : i32
    %390 = arith.index_cast %389 : i32 to index
    %c0_130 = arith.constant 0 : index
    %391 = vector.load %arg14[%390, %c0_130] : memref<64x128xf32, #tpu.memory_space<vmem>>, vector<8x128xf32>
    %c0_131 = arith.constant 0 : index
    %c0_132 = arith.constant 0 : index
    %392 = vector.load %arg15[%c0_131, %c0_132] : memref<32x128xf32, #tpu.memory_space<vmem>>, vector<32x128xf32>
    %cst_133 = arith.constant dense<0.000000e+00> : vector<8x128xf32>
    %393 = tpu.matmul %387, %392, %cst_133 {dimension_numbers = #tpu.dot_dimension_numbers<[1], [0], [0], [1], [0, 0, 1, 1], [], []>} : vector<8x32xf32>, vector<32x128xf32>, vector<8x128xf32> -> vector<8x128xf32>
    %394 = arith.addf %391, %393 : vector<8x128xf32>
    %395 = vector.extract_strided_slice %394 {offsets = [0, 0], sizes = [8, 32], strides = [1, 1]} : vector<8x128xf32> to vector<8x32xf32>
    %396 = arith.negf %395 : vector<8x32xf32>
    %397 = math.exp %396 : vector<8x32xf32>
    %cst_134 = arith.constant 1.000000e+00 : f32
    %398 = vector.broadcast %cst_134 : f32 to vector<8x32xf32>
    %399 = arith.addf %398, %397 : vector<8x32xf32>
    %400 = arith.divf %398, %399 : vector<8x32xf32>
    %401 = vector.extract_strided_slice %394 {offsets = [0, 32], sizes = [8, 32], strides = [1, 1]} : vector<8x128xf32> to vector<8x32xf32>
    %402 = arith.negf %401 : vector<8x32xf32>
    %403 = math.exp %402 : vector<8x32xf32>
    %cst_135 = arith.constant 1.000000e+00 : f32
    %404 = vector.broadcast %cst_135 : f32 to vector<8x32xf32>
    %405 = arith.addf %404, %403 : vector<8x32xf32>
    %406 = arith.divf %404, %405 : vector<8x32xf32>
    %407 = vector.extract_strided_slice %394 {offsets = [0, 64], sizes = [8, 32], strides = [1, 1]} : vector<8x128xf32> to vector<8x32xf32>
    %408 = math.tanh %407 : vector<8x32xf32>
    %409 = vector.extract_strided_slice %394 {offsets = [0, 96], sizes = [8, 32], strides = [1, 1]} : vector<8x128xf32> to vector<8x32xf32>
    %410 = arith.negf %409 : vector<8x32xf32>
    %411 = math.exp %410 : vector<8x32xf32>
    %cst_136 = arith.constant 1.000000e+00 : f32
    %412 = vector.broadcast %cst_136 : f32 to vector<8x32xf32>
    %413 = arith.addf %412, %411 : vector<8x32xf32>
    %414 = arith.divf %412, %413 : vector<8x32xf32>
    %415 = arith.mulf %406, %385 : vector<8x32xf32>
    %416 = arith.mulf %400, %408 : vector<8x32xf32>
    %417 = arith.addf %415, %416 : vector<8x32xf32>
    %418 = math.tanh %417 : vector<8x32xf32>
    %419 = arith.mulf %414, %418 : vector<8x32xf32>
    %c3_i32_137 = arith.constant 3 : i32
    %c8_i32_138 = arith.constant 8 : i32
    %420 = arith.muli %c3_i32_137, %c8_i32_138 : i32
    %421 = tpu.assume_multiple %420, 8 : i32
    %422 = arith.index_cast %421 : i32 to index
    %c0_139 = arith.constant 0 : index
    %423 = vector.load %arg14[%422, %c0_139] : memref<64x128xf32, #tpu.memory_space<vmem>>, vector<8x128xf32>
    %c0_140 = arith.constant 0 : index
    %c0_141 = arith.constant 0 : index
    %424 = vector.load %arg15[%c0_140, %c0_141] : memref<32x128xf32, #tpu.memory_space<vmem>>, vector<32x128xf32>
    %cst_142 = arith.constant dense<0.000000e+00> : vector<8x128xf32>
    %425 = tpu.matmul %419, %424, %cst_142 {dimension_numbers = #tpu.dot_dimension_numbers<[1], [0], [0], [1], [0, 0, 1, 1], [], []>} : vector<8x32xf32>, vector<32x128xf32>, vector<8x128xf32> -> vector<8x128xf32>
    %426 = arith.addf %423, %425 : vector<8x128xf32>
    %427 = vector.extract_strided_slice %426 {offsets = [0, 0], sizes = [8, 32], strides = [1, 1]} : vector<8x128xf32> to vector<8x32xf32>
    %428 = arith.negf %427 : vector<8x32xf32>
    %429 = math.exp %428 : vector<8x32xf32>
    %cst_143 = arith.constant 1.000000e+00 : f32
    %430 = vector.broadcast %cst_143 : f32 to vector<8x32xf32>
    %431 = arith.addf %430, %429 : vector<8x32xf32>
    %432 = arith.divf %430, %431 : vector<8x32xf32>
    %433 = vector.extract_strided_slice %426 {offsets = [0, 32], sizes = [8, 32], strides = [1, 1]} : vector<8x128xf32> to vector<8x32xf32>
    %434 = arith.negf %433 : vector<8x32xf32>
    %435 = math.exp %434 : vector<8x32xf32>
    %cst_144 = arith.constant 1.000000e+00 : f32
    %436 = vector.broadcast %cst_144 : f32 to vector<8x32xf32>
    %437 = arith.addf %436, %435 : vector<8x32xf32>
    %438 = arith.divf %436, %437 : vector<8x32xf32>
    %439 = vector.extract_strided_slice %426 {offsets = [0, 64], sizes = [8, 32], strides = [1, 1]} : vector<8x128xf32> to vector<8x32xf32>
    %440 = math.tanh %439 : vector<8x32xf32>
    %441 = vector.extract_strided_slice %426 {offsets = [0, 96], sizes = [8, 32], strides = [1, 1]} : vector<8x128xf32> to vector<8x32xf32>
    %442 = arith.negf %441 : vector<8x32xf32>
    %443 = math.exp %442 : vector<8x32xf32>
    %cst_145 = arith.constant 1.000000e+00 : f32
    %444 = vector.broadcast %cst_145 : f32 to vector<8x32xf32>
    %445 = arith.addf %444, %443 : vector<8x32xf32>
    %446 = arith.divf %444, %445 : vector<8x32xf32>
    %447 = arith.mulf %438, %417 : vector<8x32xf32>
    %448 = arith.mulf %432, %440 : vector<8x32xf32>
    %449 = arith.addf %447, %448 : vector<8x32xf32>
    %450 = math.tanh %449 : vector<8x32xf32>
    %451 = arith.mulf %446, %450 : vector<8x32xf32>
    %c4_i32_146 = arith.constant 4 : i32
    %c8_i32_147 = arith.constant 8 : i32
    %452 = arith.muli %c4_i32_146, %c8_i32_147 : i32
    %453 = tpu.assume_multiple %452, 8 : i32
    %454 = arith.index_cast %453 : i32 to index
    %c0_148 = arith.constant 0 : index
    %455 = vector.load %arg14[%454, %c0_148] : memref<64x128xf32, #tpu.memory_space<vmem>>, vector<8x128xf32>
    %c0_149 = arith.constant 0 : index
    %c0_150 = arith.constant 0 : index
    %456 = vector.load %arg15[%c0_149, %c0_150] : memref<32x128xf32, #tpu.memory_space<vmem>>, vector<32x128xf32>
    %cst_151 = arith.constant dense<0.000000e+00> : vector<8x128xf32>
    %457 = tpu.matmul %451, %456, %cst_151 {dimension_numbers = #tpu.dot_dimension_numbers<[1], [0], [0], [1], [0, 0, 1, 1], [], []>} : vector<8x32xf32>, vector<32x128xf32>, vector<8x128xf32> -> vector<8x128xf32>
    %458 = arith.addf %455, %457 : vector<8x128xf32>
    %459 = vector.extract_strided_slice %458 {offsets = [0, 0], sizes = [8, 32], strides = [1, 1]} : vector<8x128xf32> to vector<8x32xf32>
    %460 = arith.negf %459 : vector<8x32xf32>
    %461 = math.exp %460 : vector<8x32xf32>
    %cst_152 = arith.constant 1.000000e+00 : f32
    %462 = vector.broadcast %cst_152 : f32 to vector<8x32xf32>
    %463 = arith.addf %462, %461 : vector<8x32xf32>
    %464 = arith.divf %462, %463 : vector<8x32xf32>
    %465 = vector.extract_strided_slice %458 {offsets = [0, 32], sizes = [8, 32], strides = [1, 1]} : vector<8x128xf32> to vector<8x32xf32>
    %466 = arith.negf %465 : vector<8x32xf32>
    %467 = math.exp %466 : vector<8x32xf32>
    %cst_153 = arith.constant 1.000000e+00 : f32
    %468 = vector.broadcast %cst_153 : f32 to vector<8x32xf32>
    %469 = arith.addf %468, %467 : vector<8x32xf32>
    %470 = arith.divf %468, %469 : vector<8x32xf32>
    %471 = vector.extract_strided_slice %458 {offsets = [0, 64], sizes = [8, 32], strides = [1, 1]} : vector<8x128xf32> to vector<8x32xf32>
    %472 = math.tanh %471 : vector<8x32xf32>
    %473 = vector.extract_strided_slice %458 {offsets = [0, 96], sizes = [8, 32], strides = [1, 1]} : vector<8x128xf32> to vector<8x32xf32>
    %474 = arith.negf %473 : vector<8x32xf32>
    %475 = math.exp %474 : vector<8x32xf32>
    %cst_154 = arith.constant 1.000000e+00 : f32
    %476 = vector.broadcast %cst_154 : f32 to vector<8x32xf32>
    %477 = arith.addf %476, %475 : vector<8x32xf32>
    %478 = arith.divf %476, %477 : vector<8x32xf32>
    %479 = arith.mulf %470, %449 : vector<8x32xf32>
    %480 = arith.mulf %464, %472 : vector<8x32xf32>
    %481 = arith.addf %479, %480 : vector<8x32xf32>
    %482 = math.tanh %481 : vector<8x32xf32>
    %483 = arith.mulf %478, %482 : vector<8x32xf32>
    %c5_i32_155 = arith.constant 5 : i32
    %c8_i32_156 = arith.constant 8 : i32
    %484 = arith.muli %c5_i32_155, %c8_i32_156 : i32
    %485 = tpu.assume_multiple %484, 8 : i32
    %486 = arith.index_cast %485 : i32 to index
    %c0_157 = arith.constant 0 : index
    %487 = vector.load %arg14[%486, %c0_157] : memref<64x128xf32, #tpu.memory_space<vmem>>, vector<8x128xf32>
    %c0_158 = arith.constant 0 : index
    %c0_159 = arith.constant 0 : index
    %488 = vector.load %arg15[%c0_158, %c0_159] : memref<32x128xf32, #tpu.memory_space<vmem>>, vector<32x128xf32>
    %cst_160 = arith.constant dense<0.000000e+00> : vector<8x128xf32>
    %489 = tpu.matmul %483, %488, %cst_160 {dimension_numbers = #tpu.dot_dimension_numbers<[1], [0], [0], [1], [0, 0, 1, 1], [], []>} : vector<8x32xf32>, vector<32x128xf32>, vector<8x128xf32> -> vector<8x128xf32>
    %490 = arith.addf %487, %489 : vector<8x128xf32>
    %491 = vector.extract_strided_slice %490 {offsets = [0, 0], sizes = [8, 32], strides = [1, 1]} : vector<8x128xf32> to vector<8x32xf32>
    %492 = arith.negf %491 : vector<8x32xf32>
    %493 = math.exp %492 : vector<8x32xf32>
    %cst_161 = arith.constant 1.000000e+00 : f32
    %494 = vector.broadcast %cst_161 : f32 to vector<8x32xf32>
    %495 = arith.addf %494, %493 : vector<8x32xf32>
    %496 = arith.divf %494, %495 : vector<8x32xf32>
    %497 = vector.extract_strided_slice %490 {offsets = [0, 32], sizes = [8, 32], strides = [1, 1]} : vector<8x128xf32> to vector<8x32xf32>
    %498 = arith.negf %497 : vector<8x32xf32>
    %499 = math.exp %498 : vector<8x32xf32>
    %cst_162 = arith.constant 1.000000e+00 : f32
    %500 = vector.broadcast %cst_162 : f32 to vector<8x32xf32>
    %501 = arith.addf %500, %499 : vector<8x32xf32>
    %502 = arith.divf %500, %501 : vector<8x32xf32>
    %503 = vector.extract_strided_slice %490 {offsets = [0, 64], sizes = [8, 32], strides = [1, 1]} : vector<8x128xf32> to vector<8x32xf32>
    %504 = math.tanh %503 : vector<8x32xf32>
    %505 = vector.extract_strided_slice %490 {offsets = [0, 96], sizes = [8, 32], strides = [1, 1]} : vector<8x128xf32> to vector<8x32xf32>
    %506 = arith.negf %505 : vector<8x32xf32>
    %507 = math.exp %506 : vector<8x32xf32>
    %cst_163 = arith.constant 1.000000e+00 : f32
    %508 = vector.broadcast %cst_163 : f32 to vector<8x32xf32>
    %509 = arith.addf %508, %507 : vector<8x32xf32>
    %510 = arith.divf %508, %509 : vector<8x32xf32>
    %511 = arith.mulf %502, %481 : vector<8x32xf32>
    %512 = arith.mulf %496, %504 : vector<8x32xf32>
    %513 = arith.addf %511, %512 : vector<8x32xf32>
    %514 = math.tanh %513 : vector<8x32xf32>
    %515 = arith.mulf %510, %514 : vector<8x32xf32>
    %c6_i32_164 = arith.constant 6 : i32
    %c8_i32_165 = arith.constant 8 : i32
    %516 = arith.muli %c6_i32_164, %c8_i32_165 : i32
    %517 = tpu.assume_multiple %516, 8 : i32
    %518 = arith.index_cast %517 : i32 to index
    %c0_166 = arith.constant 0 : index
    %519 = vector.load %arg14[%518, %c0_166] : memref<64x128xf32, #tpu.memory_space<vmem>>, vector<8x128xf32>
    %c0_167 = arith.constant 0 : index
    %c0_168 = arith.constant 0 : index
    %520 = vector.load %arg15[%c0_167, %c0_168] : memref<32x128xf32, #tpu.memory_space<vmem>>, vector<32x128xf32>
    %cst_169 = arith.constant dense<0.000000e+00> : vector<8x128xf32>
    %521 = tpu.matmul %515, %520, %cst_169 {dimension_numbers = #tpu.dot_dimension_numbers<[1], [0], [0], [1], [0, 0, 1, 1], [], []>} : vector<8x32xf32>, vector<32x128xf32>, vector<8x128xf32> -> vector<8x128xf32>
    %522 = arith.addf %519, %521 : vector<8x128xf32>
    %523 = vector.extract_strided_slice %522 {offsets = [0, 0], sizes = [8, 32], strides = [1, 1]} : vector<8x128xf32> to vector<8x32xf32>
    %524 = arith.negf %523 : vector<8x32xf32>
    %525 = math.exp %524 : vector<8x32xf32>
    %cst_170 = arith.constant 1.000000e+00 : f32
    %526 = vector.broadcast %cst_170 : f32 to vector<8x32xf32>
    %527 = arith.addf %526, %525 : vector<8x32xf32>
    %528 = arith.divf %526, %527 : vector<8x32xf32>
    %529 = vector.extract_strided_slice %522 {offsets = [0, 32], sizes = [8, 32], strides = [1, 1]} : vector<8x128xf32> to vector<8x32xf32>
    %530 = arith.negf %529 : vector<8x32xf32>
    %531 = math.exp %530 : vector<8x32xf32>
    %cst_171 = arith.constant 1.000000e+00 : f32
    %532 = vector.broadcast %cst_171 : f32 to vector<8x32xf32>
    %533 = arith.addf %532, %531 : vector<8x32xf32>
    %534 = arith.divf %532, %533 : vector<8x32xf32>
    %535 = vector.extract_strided_slice %522 {offsets = [0, 64], sizes = [8, 32], strides = [1, 1]} : vector<8x128xf32> to vector<8x32xf32>
    %536 = math.tanh %535 : vector<8x32xf32>
    %537 = vector.extract_strided_slice %522 {offsets = [0, 96], sizes = [8, 32], strides = [1, 1]} : vector<8x128xf32> to vector<8x32xf32>
    %538 = arith.negf %537 : vector<8x32xf32>
    %539 = math.exp %538 : vector<8x32xf32>
    %cst_172 = arith.constant 1.000000e+00 : f32
    %540 = vector.broadcast %cst_172 : f32 to vector<8x32xf32>
    %541 = arith.addf %540, %539 : vector<8x32xf32>
    %542 = arith.divf %540, %541 : vector<8x32xf32>
    %543 = arith.mulf %534, %513 : vector<8x32xf32>
    %544 = arith.mulf %528, %536 : vector<8x32xf32>
    %545 = arith.addf %543, %544 : vector<8x32xf32>
    %546 = math.tanh %545 : vector<8x32xf32>
    %547 = arith.mulf %542, %546 : vector<8x32xf32>
    %c7_i32_173 = arith.constant 7 : i32
    %c8_i32_174 = arith.constant 8 : i32
    %548 = arith.muli %c7_i32_173, %c8_i32_174 : i32
    %549 = tpu.assume_multiple %548, 8 : i32
    %550 = arith.index_cast %549 : i32 to index
    %c0_175 = arith.constant 0 : index
    %551 = vector.load %arg14[%550, %c0_175] : memref<64x128xf32, #tpu.memory_space<vmem>>, vector<8x128xf32>
    %c0_176 = arith.constant 0 : index
    %c0_177 = arith.constant 0 : index
    %552 = vector.load %arg15[%c0_176, %c0_177] : memref<32x128xf32, #tpu.memory_space<vmem>>, vector<32x128xf32>
    %cst_178 = arith.constant dense<0.000000e+00> : vector<8x128xf32>
    %553 = tpu.matmul %547, %552, %cst_178 {dimension_numbers = #tpu.dot_dimension_numbers<[1], [0], [0], [1], [0, 0, 1, 1], [], []>} : vector<8x32xf32>, vector<32x128xf32>, vector<8x128xf32> -> vector<8x128xf32>
    %554 = arith.addf %551, %553 : vector<8x128xf32>
    %555 = vector.extract_strided_slice %554 {offsets = [0, 0], sizes = [8, 32], strides = [1, 1]} : vector<8x128xf32> to vector<8x32xf32>
    %556 = arith.negf %555 : vector<8x32xf32>
    %557 = math.exp %556 : vector<8x32xf32>
    %cst_179 = arith.constant 1.000000e+00 : f32
    %558 = vector.broadcast %cst_179 : f32 to vector<8x32xf32>
    %559 = arith.addf %558, %557 : vector<8x32xf32>
    %560 = arith.divf %558, %559 : vector<8x32xf32>
    %561 = vector.extract_strided_slice %554 {offsets = [0, 32], sizes = [8, 32], strides = [1, 1]} : vector<8x128xf32> to vector<8x32xf32>
    %562 = arith.negf %561 : vector<8x32xf32>
    %563 = math.exp %562 : vector<8x32xf32>
    %cst_180 = arith.constant 1.000000e+00 : f32
    %564 = vector.broadcast %cst_180 : f32 to vector<8x32xf32>
    %565 = arith.addf %564, %563 : vector<8x32xf32>
    %566 = arith.divf %564, %565 : vector<8x32xf32>
    %567 = vector.extract_strided_slice %554 {offsets = [0, 64], sizes = [8, 32], strides = [1, 1]} : vector<8x128xf32> to vector<8x32xf32>
    %568 = math.tanh %567 : vector<8x32xf32>
    %569 = vector.extract_strided_slice %554 {offsets = [0, 96], sizes = [8, 32], strides = [1, 1]} : vector<8x128xf32> to vector<8x32xf32>
    %570 = arith.negf %569 : vector<8x32xf32>
    %571 = math.exp %570 : vector<8x32xf32>
    %cst_181 = arith.constant 1.000000e+00 : f32
    %572 = vector.broadcast %cst_181 : f32 to vector<8x32xf32>
    %573 = arith.addf %572, %571 : vector<8x32xf32>
    %574 = arith.divf %572, %573 : vector<8x32xf32>
    %575 = arith.mulf %566, %545 : vector<8x32xf32>
    %576 = arith.mulf %560, %568 : vector<8x32xf32>
    %577 = arith.addf %575, %576 : vector<8x32xf32>
    %578 = math.tanh %577 : vector<8x32xf32>
    %579 = arith.mulf %574, %578 : vector<8x32xf32>
    %c8_i32_182 = arith.constant 8 : i32
    %580 = tpu.iota {dimensions = array<i32: 0>} : vector<8x1xi32>
    %c4_i32_183 = arith.constant 4 : i32
    %581 = vector.broadcast %c4_i32_183 : i32 to vector<8x1xi32>
    %582 = arith.cmpi slt, %580, %581 : vector<8x1xi32>
    %583 = arith.extui %582 : vector<8x1xi1> to vector<8x1xi32>
    %584 = arith.sitofp %583 : vector<8x1xi32> to vector<8x1xf32>
    %585 = vector.broadcast %584 : vector<8x1xf32> to vector<8x32xf32>
    %586 = arith.mulf %579, %585 : vector<8x32xf32>
    %cst_184 = arith.constant dense<0.000000e+00> : vector<32xf32>
    %587 = vector.multi_reduction <add>, %586, %cst_184 [0] : vector<8x32xf32> to vector<32xf32>
    %588 = vector.shape_cast %587 : vector<32xf32> to vector<1x32xf32>
    %cst_185 = arith.constant 2.500000e-01 : f32
    %589 = vector.broadcast %cst_185 : f32 to vector<1x32xf32>
    %590 = arith.mulf %588, %589 : vector<1x32xf32>
    %591 = arith.mulf %586, %586 : vector<8x32xf32>
    %cst_186 = arith.constant dense<0.000000e+00> : vector<32xf32>
    %592 = vector.multi_reduction <add>, %591, %cst_186 [0] : vector<8x32xf32> to vector<32xf32>
    %593 = vector.shape_cast %592 : vector<32xf32> to vector<1x32xf32>
    %cst_187 = arith.constant 2.500000e-01 : f32
    %594 = vector.broadcast %cst_187 : f32 to vector<1x32xf32>
    %595 = arith.mulf %593, %594 : vector<1x32xf32>
    %596 = arith.mulf %590, %590 : vector<1x32xf32>
    %597 = arith.subf %595, %596 : vector<1x32xf32>
    %cst_188 = arith.constant 0.000000e+00 : f32
    %598 = vector.broadcast %cst_188 : f32 to vector<1x32xf32>
    %599 = arith.maximumf %597, %598 : vector<1x32xf32>
    %600 = vector.broadcast %590 : vector<1x32xf32> to vector<8x32xf32>
    %601 = arith.subf %579, %600 : vector<8x32xf32>
    %cst_189 = arith.constant 9.99999974E-6 : f32
    %602 = vector.broadcast %cst_189 : f32 to vector<1x32xf32>
    %603 = arith.addf %599, %602 : vector<1x32xf32>
    %604 = math.rsqrt %603 : vector<1x32xf32>
    %605 = vector.broadcast %604 : vector<1x32xf32> to vector<8x32xf32>
    %606 = arith.mulf %601, %605 : vector<8x32xf32>
    %c0_190 = arith.constant 0 : index
    %c0_191 = arith.constant 0 : index
    %607 = vector.load %arg9[%c0_190, %c0_191] : memref<1x32xf32, #tpu.memory_space<vmem>>, vector<1x32xf32>
    %608 = vector.broadcast %607 : vector<1x32xf32> to vector<8x32xf32>
    %609 = arith.mulf %606, %608 : vector<8x32xf32>
    %c0_192 = arith.constant 0 : index
    %c0_193 = arith.constant 0 : index
    %610 = vector.load %arg10[%c0_192, %c0_193] : memref<1x32xf32, #tpu.memory_space<vmem>>, vector<1x32xf32>
    %611 = vector.broadcast %610 : vector<1x32xf32> to vector<8x32xf32>
    %612 = arith.addf %609, %611 : vector<8x32xf32>
    %c0_194 = arith.constant 0 : index
    %c0_195 = arith.constant 0 : index
    %613 = vector.load %arg11[%c0_194, %c0_195] : memref<32x128xf32, #tpu.memory_space<vmem>>, vector<32x128xf32>
    %cst_196 = arith.constant dense<0.000000e+00> : vector<8x128xf32>
    %614 = tpu.matmul %612, %613, %cst_196 {dimension_numbers = #tpu.dot_dimension_numbers<[1], [0], [0], [1], [0, 0, 1, 1], [], []>} : vector<8x32xf32>, vector<32x128xf32>, vector<8x128xf32> -> vector<8x128xf32>
    %c0_197 = arith.constant 0 : index
    %c0_198 = arith.constant 0 : index
    %615 = vector.load %arg12[%c0_197, %c0_198] : memref<1x128xf32, #tpu.memory_space<vmem>>, vector<1x128xf32>
    %616 = vector.broadcast %615 : vector<1x128xf32> to vector<8x128xf32>
    %617 = arith.addf %614, %616 : vector<8x128xf32>
    %c0_199 = arith.constant 0 : index
    %c0_200 = arith.constant 0 : index
    %618 = vector.load %arg13[%c0_199, %c0_200] : memref<8x128xf32, #tpu.memory_space<vmem>>, vector<8x128xf32>
    tpu.vector_store %arg13[%c0_199, %c0_200], %617 {strides = array<i32>} : memref<8x128xf32, #tpu.memory_space<vmem>>, vector<8x128xf32>,
    return
  }
}

</mosaic_0001>

<bundles_post_ra>
// kernel: lstm_model_forward.1
= control target key start
LH: loop header
LB: loop body
LE: loop exit
PB: predicated region body
PF: predicated region fallthrough
CT: control target
= control target key end

     0   :  { %vm52_vm0 = vcmask 130048   ;;  %v2977_v0 = vmov 0.0|0.0   ;;  %vm2978_vm1 = vmmov 0   ;;  %v2979_v4 = vmov 0.0   ;;  %s2980_s14 = smov 64   ;;  %s2982_s23 = smov 96   ;;  %s3515_s4 = inlined_call_operand.vmem [shape: bf16[32,128], index: 4, kind: input, shape index: {}]   ;;  %s3516_s3 = inlined_call_operand.vmem [shape: bf16[16,128], index: 3, kind: input, shape index: {}]   ;;  %s3517_s0 = inlined_call_operand.vmem [shape: f32[64,16], index: 0, kind: input, shape index: {}]   ;;  %s3518_s1 = inlined_call_operand.vmem [shape: f32[1,16], index: 1, kind: input, shape index: {}]   ;;  %s3519_s2 = inlined_call_operand.vmem [shape: f32[1,16], index: 2, kind: input, shape index: {}]   ;;  %s3520_s5 = inlined_call_operand.vmem [shape: f32[1,128], index: 5, kind: input, shape index: {}]   ;;  %s3521_s6 = inlined_call_operand.vmem [shape: bf16[32,128], index: 6, kind: input, shape index: {}]   ;;  %s3522_s7 = inlined_call_operand.vmem [shape: bf16[32,128], index: 7, kind: input, shape index: {}]   ;;  %s3523_s8 = inlined_call_operand.vmem [shape: f32[1,128], index: 8, kind: input, shape index: {}]   ;;  %s3524_s9 = inlined_call_operand.vmem [shape: f32[1,32], index: 9, kind: input, shape index: {}]   ;;  %s3525_s10 = inlined_call_operand.vmem [shape: f32[1,32], index: 10, kind: input, shape index: {}]   ;;  %s3526_s11 = inlined_call_operand.vmem [shape: f32[32,128], index: 11, kind: input, shape index: {}]   ;;  %s3527_s12 = inlined_call_operand.vmem [shape: f32[1,128], index: 12, kind: input, shape index: {}]   ;;  %s3528_s13 = inlined_call_operand.vmem [shape: f32[8,128], index: 13, kind: output, shape index: {}]  }
   0x1   :  { %2729 = vmatprep.subr.bf16.mxu1 %v2977_v0  ;;  %v3057_v1 = vld [vmem:[%s3515_s4] sm:$0xff]   ;;  %2526 = vmatprep.mubr.msk.f32.mxu1 %vm2978_vm1, %v2979_v4  ;;  %v3073_v5 = vld [vmem:[%s3517_s0 + $0x8] sm:$0xff]  ;;  %v3078_v6 = vld [vmem:[%s3517_s0 + $0x10] sm:$0xff]  ;;  %vm321_vm2 = vcmask 261120   ;;  %vm2173_vm4 = vcmask 1048320  }
   0x2   :  { %v2365_v2 = vld [vmem:[%s3516_s3] sm:$0xff]   ;;  %2731 = vmatpush3.bf16.msra.mxu1 %v3057_v1  ;;  %v3083_v7 = vld [vmem:[%s3517_s0 + $0x18] sm:$0xff]  ;;  %v54_v10 = vsel %vm52_vm0, %v3073_v5, 0.0  ;;  %v56_v11 = vsel %vm52_vm0, %v3078_v6, 0.0  ;;  %v76_v13 = vmul.f32 %v3073_v5, %v3073_v5  ;;  %v77_v16 = vmul.f32 %v3078_v6, %v3078_v6  ;;  %v3111_v18 = vld [vmem:[%s3515_s4 + $0x8] sm:$0xff]  }
   0x3   :  { %v3065_v3 = vld [vmem:[%s3517_s0] sm:$0xff]  ;;  %2726 = vmatprep.subr.bf16.mxu0 %v2365_v2  ;;  %2732 = vmatprep.subr.bf16.mxu1 %v2977_v0  ;;  %v58_v15 = vsel %vm52_vm0, %v3083_v7, 0.0  ;;  %v78_v17 = vmul.f32 %v3083_v7, %v3083_v7  ;;  %v3116_v19 = vld [vmem:[%s3517_s0 + $0x28] sm:$0xff]  ;;  %v3130_v26 = vld [vmem:[%s3517_s0 + $0x30] sm:$0xff] }
   0x4   :  { %v53_v8 = vsel %vm52_vm0, %v3065_v3, 0.0  ;;  %2728 = vmatpush3.bf16.msra.mxu0 %v2365_v2  ;;  %v3091_v9 = vld [vmem:[%s3517_s0 + $0x20] sm:$0xff]  ;;  %v75_v12 = vmul.f32 %v3065_v3, %v3065_v3  ;;  %v84_v24 = vsel %vm52_vm0, %v76_v13, 0.0  ;;  %v86_v25 = vsel %vm52_vm0, %v77_v16, 0.0  ;;  %v3141_v32 = vld [vmem:[%s3517_s0 + $0x38] sm:$0xff] }
   0x5   :  { %v55_v14 = vadd.f32 %v54_v10, %v53_v8  ;;  %2741 = vmatprep.subr.bf16.mxu0 %v2977_v0  ;;  %v60_v21 = vsel %vm52_vm0, %v3091_v9, 0.0  ;;  %v79_v22 = vmul.f32 %v3091_v9, %v3091_v9  ;;  %v62_v29 = vsel %vm52_vm0, %v3116_v19, 0.0  ;;  %v3174_v16 = vld [vmem:[%s3518_s1] ss:$0 sm:$0xff] }
   0x6   :  { %2734 = vmatpush3.bf16.msra.mxu1 %v3111_v18  ;;  %v83_v23 = vsel %vm52_vm0, %v75_v12, 0.0  ;;  %v80_v30 = vmul.f32 %v3116_v19, %v3116_v19  ;;  %v88_v31 = vsel %vm52_vm0, %v78_v17, 0.0  ;;  %v64_v35 = vsel %vm52_vm0, %v3130_v26, 0.0 }
   0x7   :  { %v57_v20 = vadd.f32 %v56_v11, %v55_v14  ;;  %2735 = vmatprep.subr.bf16.mxu1 %v2977_v0  ;;  %v85_v28 = vadd.f32 %v84_v24, %v83_v23  ;;  %v81_v36 = vmul.f32 %v3130_v26, %v3130_v26  ;;  %v90_v37 = vsel %vm52_vm0, %v79_v22, 0.0 }
   0x8   :  { %v66_v40 = vsel %vm52_vm0, %v3141_v32, 0.0  ;;  %v82_v41 = vmul.f32 %v3141_v32, %v3141_v32  ;;  %v92_v42 = vsel %vm52_vm0, %v80_v30, 0.0 }
   0x9   :  { %v59_v27 = vadd.f32 %v58_v15, %v57_v20  ;;  %2527 = vmatmul.mubr.f32.vlgmr.msra.gmra.mrb[0].mxu1 %v2979_v4  ;;  %v87_v34 = vadd.f32 %v86_v25, %v85_v28  ;;  %v94_v45 = vsel %vm52_vm0, %v81_v36, 0.0 }
   0xa   :  { %2737 = vmatpush3.bf16.msra.mxu1 %v3057_v1  ;;  %2537 = vmatprep.mubr.msk.f32.mxu1 %vm2978_vm1, %v2979_v4  ;;  %v96_v48 = vsel %vm52_vm0, %v82_v41, 0.0 }
   0xb   :  { %v61_v33 = vadd.f32 %v60_v21, %v59_v27  ;;  %2738 = vmatprep.subr.bf16.mxu1 %v2977_v0  ;;  %v89_v39 = vadd.f32 %v88_v31, %v87_v34  ;;  %v3181_v21 = vld [vmem:[%s3519_s2] ss:$0 sm:$0xff] }
   0xc   :  { %v3196_v27 = vld [vmem:[%s3520_s5] ss:$0 sm:$0xff]  ;;  %s2981_s5 = smov 32  }
   0xd   :  { %v63_v38 = vadd.f32 %v62_v29, %v61_v33  ;;  %v91_v44 = vadd.f32 %v90_v37, %v89_v39 }
   0xe   :  { %2740 = vmatpush3.bf16.msra.mxu1 %v3111_v18 }
   0xf   :  { %v65_v43 = vadd.f32 %v64_v35, %v63_v38  ;;  %2747 = vmatprep.subr.bf16.mxu1 %v2977_v0  ;;  %v93_v47 = vadd.f32 %v92_v42, %v91_v44 }
  0x11   :  { %v67_v46 = vadd.f32 %v66_v40, %v65_v43  ;;  %v95_v50 = vadd.f32 %v94_v45, %v93_v47 }
  0x13   :  { %v68_v49 = vrot.slane %v67_v46, 4  ;;  %v97_v52 = vadd.f32 %v96_v48, %v95_v50 }
  0x15   :  { %v69_v51 = vadd.f32 %v68_v49, %v67_v46  ;;  %v98_v54 = vrot.slane %v97_v52, 4 }
  0x17   :  { %v70_v53 = vrot.slane %v69_v51, 2  ;;  %v99_v56 = vadd.f32 %v98_v54, %v97_v52 }
  0x19   :  { %v71_v55 = vadd.f32 %v70_v53, %v69_v51  ;;  %v100_v58 = vrot.slane %v99_v56, 2 }
  0x1b   :  { %v72_v57 = vrot.slane %v71_v55, 1  ;;  %v101_v60 = vadd.f32 %v100_v58, %v99_v56 }
  0x1d   :  { %v73_v59 = vadd.f32 %v72_v57, %v71_v55  ;;  %v102_v62 = vrot.slane %v101_v60, 1 }
  0x1f   :  { %v3161_v61 = vmul.f32 0.03125, %v73_v59  ;;  %v103_v63 = vadd.f32 %v102_v62, %v101_v60 }
  0x21   :  { %v105_v2 = vmul.f32 %v3161_v61, %v3161_v61  ;;  %v104_v8 = vmul.f32 0.03125, %v103_v63  ;;  %v108_v13 = vsub.f32 %v3065_v3, %v3161_v61  ;;  %v109_v14 = vsub.f32 %v3073_v5, %v3161_v61 }
  0x22   :  { %v110_v62 = vsub.f32 %v3078_v6, %v3161_v61  ;;  %v111_v63 = vsub.f32 %v3083_v7, %v3161_v61 }
  0x23   :  { %v106_v10 = vsub.f32 %v104_v8, %v105_v2  ;;  %v112_v2 = vsub.f32 %v3091_v9, %v3161_v61  ;;  %v113_v8 = vsub.f32 %v3116_v19, %v3161_v61 }
  0x25   :  { %v107_v11 = vmax.f32 %v106_v10, 0.0  ;;  %v114_v10 = vsub.f32 %v3130_v26, %v3161_v61 }
  0x27   :  { %v116_v12 = vadd.f32 1e-05, %v107_v11  ;;  %v115_v11 = vsub.f32 %v3141_v32, %v3161_v61 }
  0x29   :  { %2845 = vrsqrt.f32 %v116_v12 }
  0x33   :  { %v3169_v15 = vpop.eup %2845 }
  0x34   :  { %v118_v17 = vmul.f32 %v3169_v15, %v108_v13  ;;  %v119_v20 = vmul.f32 %v3169_v15, %v109_v14  ;;  %v120_v12 = vmul.f32 %v3169_v15, %v110_v62  ;;  %v121_v13 = vmul.f32 %v3169_v15, %v111_v63 }
  0x35   :  { %v122_v6 = vmul.f32 %v3169_v15, %v112_v2  ;;  %v123_v7 = vmul.f32 %v3169_v15, %v113_v8  ;;  %v124_v14 = vmul.f32 %v3169_v15, %v114_v10  ;;  %v125_v32 = vmul.f32 %v3169_v15, %v115_v11 }
  0x36   :  { %v133_v3 = vmul.f32 %v3174_v16, %v118_v17  ;;  %v134_v5 = vmul.f32 %v3174_v16, %v119_v20  ;;  %v135_v9 = vmul.f32 %v3174_v16, %v120_v12  ;;  %v136_v19 = vmul.f32 %v3174_v16, %v121_v13 }
  0x37   :  { %v137_v17 = vmul.f32 %v3174_v16, %v122_v6  ;;  %v138_v26 = vmul.f32 %v3174_v16, %v123_v7 }
  0x38   :  { %v148_v22 = vadd.f32 %v3181_v21, %v133_v3  ;;  %v149_v23 = vadd.f32 %v3181_v21, %v134_v5  ;;  %v150_v61 = vadd.f32 %v3181_v21, %v135_v9  ;;  %v151_v20 = vadd.f32 %v3181_v21, %v136_v19 }
  0x39   :  { %v152_v3 = vadd.f32 %v3181_v21, %v137_v17  ;;  %v139_v5 = vmul.f32 %v3174_v16, %v124_v14 }
  0x3a   :  { %2506 = vmatprep.mubr.msk.f32.mxu0 %vm52_vm0, %v148_v22  ;;  %v153_v22 = vadd.f32 %v3181_v21, %v138_v26 }
  0x3b   :  { %2507 = vmatmul.mubr.msk.f32.vlgmr.msra.gmra.mrb[0].mxu0 %vm52_vm0, %v149_v23  ;;  %v140_v23 = vmul.f32 %v3174_v16, %v125_v32  ;;  %v154_v15 = vadd.f32 %v3181_v21, %v139_v5 }
  0x3c   :  { %2743 = vmatpush3.bf16.msra.mxu0 %v3057_v1  ;;  %2509 = vmatprep.mubr.msk.f32.mxu0 %vm52_vm0, %v150_v61 }
  0x3d   :  { %2744 = vmatprep.subr.bf16.mxu0 %v2977_v0 }
  0x3f   :  { %2510 = vmatmul.mubr.msk.f32.gmra.mrb[2].mxu0 %vm52_vm0, %v151_v20 }
  0x40   :  { %2746 = vmatpush3.bf16.msra.mxu0 %v3111_v18  ;;  %2512 = vmatprep.mubr.msk.f32.mxu0 %vm52_vm0, %v152_v3 }
  0x41   :  { %2753 = vmatprep.subr.bf16.mxu0 %v2977_v0 }
  0x43   :  { %2513 = vmatmul.mubr.msk.f32.gmra.mrb[4].mxu0 %vm52_vm0, %v153_v22 }
  0x44   :  { %2515 = vmatprep.mubr.msk.f32.mxu0 %vm52_vm0, %v154_v15 }
  0xdc   :  { %v391_v24 = vpop.f32.mrb[0].mxu1 }
  0xdd   :  { %v2528_v25 = vpop.f32.mrb[1].mxu1 }
  0xde   :  { %v155_v25 = vadd.f32 %v3181_v21, %v140_v23 }
  0xe0   :  { %2516 = vmatmul.mubr.msk.f32.gmra.mrb[6].mxu0 %vm52_vm0, %v155_v25 }
  0xe1   :  { %2548 = vmatprep.mubr.msk.f32.mxu0 %vm2978_vm1, %v2979_v4 }
 0x10e   :  { %v2508_v28 = vpop.f32.mrb[0].mxu0 }
 0x10f   :  { %v257_v29 = vpop.f32.mrb[1].mxu0  ;;  %v263_v47 = vadd.f32 %v2508_v28, %v3196_v27 }
 0x110   :  { %v258_v30 = vadd.f32 %v3196_v27, %v257_v29 }
 0x112   :  { %v395_v31 = vadd.f32 %v391_v24, %v258_v30  ;;  %v2511_v29 = vpop.f32.mrb[2].mxu0 }
 0x113   :  { %v267_v30 = vpop.f32.mrb[3].mxu0 }
 0x114   :  { %2847 = vtanh.f32 %v395_v31  ;;  %v2320_v34 = vmul.f32 -1.442695, %v395_v31 }
 0x116   :  { %2849 = vpow2.f32 %v2320_v34  ;;  %v3257_v31 = vpop.f32.mrb[4].mxu0 }
 0x11e   :  { %v2848_v33 = vpop.eup %2847 }
 0x11f   :  { %405 = vrot.lane.b32.xlu0 %v2848_v33, %s2980_s14  ;;  %v3259_v33 = vpop.f32.mrb[5].mxu0 }
 0x120   :  { %v2850_v35 = vpop.eup %2849  ;;  %v278_v9 = vadd.f32 %v3196_v27, %v3259_v33  ;;  %v283_v33 = vadd.f32 %v3257_v31, %v3196_v27 }
 0x121   :  { %v399_v36 = vadd.f32 1.0, %v2850_v35 }
 0x123   :  { %2851 = vrcp.f32 %v399_v36  ;;  %v268_v36 = vadd.f32 %v3196_v27, %v267_v30 }
 0x12d   :  { %v2852_v37 = vpop.eup %2851 }
 0x12e   :  { %v403_v40 = vmul.f32 0.0, %v2852_v37 }
 0x191   :  { %v406_v38 = vpop.permute.xlu0 %405 }
 0x192   :  { %v408_v39 = vmul.f32 %v2852_v37, %v406_v38 }
 0x194   :  { %410 = vrot.lane.b32.xlu0 %v408_v39, %s2981_s5 }
 0x1b3   :  { %v3261_v34 = vpop.f32.mrb[6].mxu0 }
 0x1b4   :  { %v3263_v21 = vpop.f32.mrb[7].mxu0 }
 0x206   :  { %v411_v41 = vpop.permute.xlu0 %410 }
 0x207   :  { %v413_v42 = vadd.f32 %v411_v41, %v403_v40 }
 0x209   :  { %2853 = vtanh.f32 %v413_v42 }
 0x213   :  { %v2854_v43 = vpop.eup %2853 }
 0x214   :  { %416 = vrot.lane.b32.xlu1 %v2854_v43, %s2980_s14 }
 0x286   :  { %v417_v44 = vpop.permute.xlu1 %416 }
 0x287   :  { %v419_v45 = vmul.f32 %v2852_v37, %v417_v44 }
 0x289   :  { %421 = vrot.lane.b32.xlu1 %v419_v45, %s2981_s5 }
 0x2fb   :  { %v422_v46 = vpop.permute.xlu1 %421 }
 0x2fc   :  { %424 = vst.msk [vmem:[#allocation4] sm:$0xff] %vm321_vm2, %v422_v46  ;;  %2538 = vmatmul.mubr.msk.f32.vlgmr.msra.gmra.mrb[2].mxu1 %vm321_vm2, %v422_v46 }
 0x2fd   :  { %2749 = vmatpush3.bf16.msra.mxu1 %v3057_v1  ;;  %2559 = vmatprep.mubr.msk.f32.mxu1 %vm2978_vm1, %v2979_v4 }
 0x2fe   :  { %2750 = vmatprep.subr.bf16.mxu1 %v2977_v0 }
 0x301   :  { %2752 = vmatpush3.bf16.msra.mxu1 %v3111_v18 }
 0x302   :  { %2759 = vmatprep.subr.bf16.mxu1 %v2977_v0 }
 0x3cf   :  { %v499_v48 = vpop.f32.mrb[2].mxu1 }
 0x3d0   :  { %v503_v49 = vadd.f32 %v499_v48, %v263_v47  ;;  %v2539_v50 = vpop.f32.mrb[3].mxu1 }
 0x3d2   :  { %2855 = vtanh.f32 %v503_v49  ;;  %v2322_v52 = vmul.f32 -1.442695, %v503_v49 }
 0x3d4   :  { %2857 = vpow2.f32 %v2322_v52 }
 0x3dc   :  { %v2856_v51 = vpop.eup %2855 }
 0x3dd   :  { %513 = vrot.lane.b32.xlu0 %v2856_v51, %s2980_s14 }
 0x3de   :  { %v2858_v53 = vpop.eup %2857 }
 0x3df   :  { %v507_v54 = vadd.f32 1.0, %v2858_v53 }
 0x3e1   :  { %2859 = vrcp.f32 %v507_v54  ;;  %v273_v54 = vadd.f32 %v2511_v29, %v3196_v27 }
 0x3eb   :  { %v2860_v55 = vpop.eup %2859 }
 0x3ec   :  { %v511_v58 = vmul.f32 %v2860_v55, %v413_v42 }
 0x44f   :  { %v514_v56 = vpop.permute.xlu0 %513 }
 0x450   :  { %v516_v57 = vmul.f32 %v2860_v55, %v514_v56 }
 0x452   :  { %518 = vrot.lane.b32.xlu1 %v516_v57, %s2981_s5 }
 0x4c4   :  { %v519_v59 = vpop.permute.xlu1 %518 }
 0x4c5   :  { %v3214_v60 = vadd.f32 %v519_v59, %v511_v58 }
 0x4c7   :  { %2861 = vtanh.f32 %v3214_v60 }
 0x4d1   :  { %v2862_v24 = vpop.eup %2861 }
 0x4d2   :  { %524 = vrot.lane.b32.xlu0 %v2862_v24, %s2980_s14 }
 0x544   :  { %v525_v28 = vpop.permute.xlu0 %524 }
 0x545   :  { %v527_v16 = vmul.f32 %v2860_v55, %v525_v28 }
 0x547   :  { %529 = vrot.lane.b32.xlu1 %v527_v16, %s2981_s5 }
 0x5b9   :  { %v530_v35 = vpop.permute.xlu1 %529 }
 0x5ba   :  { %533 = vst.msk [vmem:[#allocation4 + $0x8] sm:$0xff] %vm321_vm2, %v530_v35  ;;  %2549 = vmatmul.mubr.msk.f32.vlgmr.msra.gmra.mrb[8].mxu0 %vm321_vm2, %v530_v35 }
 0x5bb   :  { %2755 = vmatpush3.bf16.msra.mxu0 %v3057_v1  ;;  %2570 = vmatprep.mubr.msk.f32.mxu0 %vm2978_vm1, %v2979_v4 }
 0x5bc   :  { %2756 = vmatprep.subr.bf16.mxu0 %v2977_v0 }
 0x5bf   :  { %2758 = vmatpush3.bf16.msra.mxu0 %v3111_v18 }
 0x5c0   :  { %2765 = vmatprep.subr.bf16.mxu0 %v2977_v0 }
 0x68d   :  { %v608_v37 = vpop.f32.mrb[8].mxu0 }
 0x68e   :  { %v612_v38 = vadd.f32 %v608_v37, %v268_v36  ;;  %v2550_v39 = vpop.f32.mrb[9].mxu0 }
 0x690   :  { %2863 = vtanh.f32 %v612_v38  ;;  %v2324_v41 = vmul.f32 -1.442695, %v612_v38 }
 0x692   :  { %2865 = vpow2.f32 %v2324_v41 }
 0x69a   :  { %v2864_v40 = vpop.eup %2863 }
 0x69b   :  { %622 = vrot.lane.b32.xlu0 %v2864_v40, %s2980_s14 }
 0x69c   :  { %v2866_v42 = vpop.eup %2865 }
 0x69d   :  { %v616_v43 = vadd.f32 1.0, %v2866_v42 }
 0x69f   :  { %2867 = vrcp.f32 %v616_v43 }
 0x6a9   :  { %v2868_v44 = vpop.eup %2867 }
 0x6aa   :  { %v620_v47 = vmul.f32 %v2868_v44, %v3214_v60 }
 0x70d   :  { %v623_v45 = vpop.permute.xlu0 %622 }
 0x70e   :  { %v625_v46 = vmul.f32 %v2868_v44, %v623_v45  ;;  %v2377_v45 = vld [vmem:[%s3521_s6] sm:$0xff]  }
 0x710   :  { %627 = vrot.lane.b32.xlu1 %v625_v46, %s2981_s5 }
 0x782   :  { %v628_v48 = vpop.permute.xlu1 %627 }
 0x783   :  { %v630_v49 = vadd.f32 %v628_v48, %v620_v47 }
 0x785   :  { %2869 = vtanh.f32 %v630_v49 }
 0x78f   :  { %v2870_v50 = vpop.eup %2869 }
 0x790   :  { %633 = vrot.lane.b32.xlu0 %v2870_v50, %s2980_s14  ;;  %v2393_v50 = vld [vmem:[%s3521_s6 + $0x8] sm:$0xff]  }
 0x802   :  { %v634_v51 = vpop.permute.xlu0 %633 }
 0x803   :  { %v636_v52 = vmul.f32 %v2868_v44, %v634_v51  ;;  %v1188_v51 = vld [vmem:[#allocation4] sm:$0xff] }
 0x805   :  { %638 = vrot.lane.b32.xlu1 %v636_v52, %s2981_s5  ;;  %v1189_v52 = vld [vmem:[#allocation4 + $0x8] sm:$0xff] }
 0x877   :  { %v639_v53 = vpop.permute.xlu1 %638 }
 0x878   :  { %642 = vst.msk [vmem:[#allocation4 + $0x10] sm:$0xff] %vm321_vm2, %v639_v53  ;;  %2560 = vmatmul.mubr.msk.f32.vlgmr.msra.gmra.mrb[4].mxu1 %vm321_vm2, %v639_v53 }
 0x879   :  { %2761 = vmatpush3.bf16.msra.mxu1 %v3057_v1  ;;  %2581 = vmatprep.mubr.msk.f32.mxu1 %vm2978_vm1, %v2979_v4 }
 0x87a   :  { %2762 = vmatprep.subr.bf16.mxu1 %v2977_v0 }
 0x87d   :  { %2764 = vmatpush3.bf16.msra.mxu1 %v3111_v18 }
 0x87e   :  { %2771 = vmatprep.subr.bf16.mxu1 %v2977_v0 }
 0x87f   :  { %v1190_v53 = vld [vmem:[#allocation4 + $0x10] sm:$0xff] }
 0x94b   :  { %v717_v55 = vpop.f32.mrb[4].mxu1 }
 0x94c   :  { %v721_v56 = vadd.f32 %v717_v55, %v273_v54  ;;  %v2561_v57 = vpop.f32.mrb[5].mxu1 }
 0x94d   :  { %v288_v57 = vadd.f32 %v3196_v27, %v3263_v21 }
 0x94e   :  { %2871 = vtanh.f32 %v721_v56  ;;  %v2326_v59 = vmul.f32 -1.442695, %v721_v56 }
 0x950   :  { %2873 = vpow2.f32 %v2326_v59 }
 0x958   :  { %v2872_v58 = vpop.eup %2871 }
 0x959   :  { %731 = vrot.lane.b32.xlu0 %v2872_v58, %s2980_s14 }
 0x95a   :  { %v2874_v60 = vpop.eup %2873 }
 0x95b   :  { %v725_v62 = vadd.f32 1.0, %v2874_v60 }
 0x95d   :  { %2875 = vrcp.f32 %v725_v62 }
 0x967   :  { %v2876_v63 = vpop.eup %2875 }
 0x968   :  { %v729_v10 = vmul.f32 %v2876_v63, %v630_v49 }
 0x9cb   :  { %v732_v2 = vpop.permute.xlu0 %731 }
 0x9cc   :  { %v734_v8 = vmul.f32 %v2876_v63, %v732_v2 }
 0x9ce   :  { %736 = vrot.lane.b32.xlu1 %v734_v8, %s2981_s5 }
 0xa40   :  { %v737_v11 = vpop.permute.xlu1 %736 }
 0xa41   :  { %v739_v12 = vadd.f32 %v737_v11, %v729_v10 }
 0xa43   :  { %2877 = vtanh.f32 %v739_v12 }
 0xa4d   :  { %v2878_v13 = vpop.eup %2877 }
 0xa4e   :  { %742 = vrot.lane.b32.xlu0 %v2878_v13, %s2980_s14 }
 0xac0   :  { %v743_v6 = vpop.permute.xlu0 %742 }
 0xac1   :  { %v745_v7 = vmul.f32 %v2876_v63, %v743_v6 }
 0xac3   :  { %747 = vrot.lane.b32.xlu1 %v745_v7, %s2981_s5 }
 0xb35   :  { %v748_v14 = vpop.permute.xlu1 %747 }
 0xb36   :  { %751 = vst.msk [vmem:[#allocation4 + $0x18] sm:$0xff] %vm321_vm2, %v748_v14  ;;  %2571 = vmatmul.mubr.msk.f32.vlgmr.msra.gmra.mrb[10].mxu0 %vm321_vm2, %v748_v14 }
 0xb37   :  { %2767 = vmatpush3.bf16.msra.mxu0 %v3057_v1  ;;  %2592 = vmatprep.mubr.msk.f32.mxu0 %vm2978_vm1, %v2979_v4 }
 0xb38   :  { %2768 = vmatprep.subr.bf16.mxu0 %v2977_v0 }
 0xb3b   :  { %2770 = vmatpush3.bf16.msra.mxu0 %v3111_v18 }
 0xb3c   :  { %2778 = vmatprep.subr.bf16.mxu0 %v2377_v45 }
 0xb3d   :  { %v1191_v54 = vld [vmem:[#allocation4 + $0x18] sm:$0xff] }
 0xc09   :  { %v826_v19 = vpop.f32.mrb[10].mxu0 }
 0xc0a   :  { %v830_v17 = vadd.f32 %v826_v19, %v278_v9  ;;  %v2572_v26 = vpop.f32.mrb[11].mxu0 }
 0xc0c   :  { %2879 = vtanh.f32 %v830_v17  ;;  %v2328_v61 = vmul.f32 -1.442695, %v830_v17 }
 0xc0e   :  { %2881 = vpow2.f32 %v2328_v61  ;;  %v3355_v61 = vld [vmem:[%s3522_s7] sm:$0xff]  }
 0xc16   :  { %v2880_v32 = vpop.eup %2879 }
 0xc17   :  { %840 = vrot.lane.b32.xlu0 %v2880_v32, %s2980_s14 }
 0xc18   :  { %v2882_v20 = vpop.eup %2881 }
 0xc19   :  { %v834_v3 = vadd.f32 1.0, %v2882_v20  ;;  %v3362_v20 = vld [vmem:[%s3522_s7 + $0x8] sm:$0xff]  }
 0xc1b   :  { %2883 = vrcp.f32 %v834_v3 }
 0xc25   :  { %v2884_v5 = vpop.eup %2883 }
 0xc26   :  { %v838_v24 = vmul.f32 %v2884_v5, %v739_v12 }
 0xc89   :  { %v841_v22 = vpop.permute.xlu0 %840 }
 0xc8a   :  { %v843_v23 = vmul.f32 %v2884_v5, %v841_v22 }
 0xc8c   :  { %845 = vrot.lane.b32.xlu1 %v843_v23, %s2981_s5 }
 0xcfe   :  { %v846_v15 = vpop.permute.xlu1 %845 }
 0xcff   :  { %v848_v25 = vadd.f32 %v846_v15, %v838_v24  ;;  %v293_v24 = vadd.f32 %v3261_v34, %v3196_v27 }
 0xd01   :  { %2885 = vtanh.f32 %v848_v25 }
 0xd0b   :  { %v2886_v28 = vpop.eup %2885 }
 0xd0c   :  { %851 = vrot.lane.b32.xlu0 %v2886_v28, %s2980_s14 }
 0xd7e   :  { %v852_v16 = vpop.permute.xlu0 %851 }
 0xd7f   :  { %v854_v29 = vmul.f32 %v2884_v5, %v852_v16  ;;  %v3388_v16 = vld [vmem:[%s3523_s8] ss:$0 sm:$0xff] }
 0xd81   :  { %856 = vrot.lane.b32.xlu1 %v854_v29, %s2981_s5 }
 0xdf3   :  { %v857_v30 = vpop.permute.xlu1 %856 }
 0xdf4   :  { %860 = vst.msk [vmem:[#allocation4 + $0x20] sm:$0xff] %vm321_vm2, %v857_v30  ;;  %2582 = vmatmul.mubr.msk.f32.vlgmr.msra.gmra.mrb[6].mxu1 %vm321_vm2, %v857_v30 }
 0xdf5   :  { %2773 = vmatpush3.bf16.msra.mxu1 %v3057_v1  ;;  %2603 = vmatprep.mubr.msk.f32.mxu1 %vm2978_vm1, %v2979_v4 }
 0xdf6   :  { %2774 = vmatprep.subr.bf16.mxu1 %v2977_v0 }
 0xdf9   :  { %2776 = vmatpush3.bf16.msra.mxu1 %v3111_v18 }
 0xdfa   :  { %2785 = vmatprep.subr.bf16.mxu1 %v2977_v0 }
 0xdfb   :  { %v1192_v55 = vld [vmem:[#allocation4 + $0x20] sm:$0xff] }
 0xec7   :  { %v935_v35 = vpop.f32.mrb[6].mxu1 }
 0xec8   :  { %v939_v36 = vadd.f32 %v935_v35, %v283_v33  ;;  %v2583_v37 = vpop.f32.mrb[7].mxu1 }
 0xeca   :  { %2887 = vtanh.f32 %v939_v36  ;;  %v2330_v1 = vmul.f32 -1.442695, %v939_v36 }
 0xecc   :  { %2889 = vpow2.f32 %v2330_v1 }
 0xed4   :  { %v2888_v38 = vpop.eup %2887 }
 0xed5   :  { %949 = vrot.lane.b32.xlu0 %v2888_v38, %s2980_s14 }
 0xed6   :  { %v2890_v39 = vpop.eup %2889 }
 0xed7   :  { %v943_v40 = vadd.f32 1.0, %v2890_v39 }
 0xed9   :  { %2891 = vrcp.f32 %v943_v40 }
 0xee3   :  { %v2892_v41 = vpop.eup %2891 }
 0xee4   :  { %v947_v43 = vmul.f32 %v2892_v41, %v848_v25 }
 0xf47   :  { %v950_v42 = vpop.permute.xlu0 %949 }
 0xf48   :  { %v952_v18 = vmul.f32 %v2892_v41, %v950_v42 }
 0xf4a   :  { %954 = vrot.lane.b32.xlu1 %v952_v18, %s2981_s5 }
 0xfbc   :  { %v955_v44 = vpop.permute.xlu1 %954 }
 0xfbd   :  { %v957_v31 = vadd.f32 %v955_v44, %v947_v43 }
 0xfbf   :  { %2893 = vtanh.f32 %v957_v31 }
 0xfc9   :  { %v2894_v46 = vpop.eup %2893 }
 0xfca   :  { %960 = vrot.lane.b32.xlu0 %v2894_v46, %s2980_s14 }
0x103c   :  { %v961_v47 = vpop.permute.xlu0 %960 }
0x103d   :  { %v963_v48 = vmul.f32 %v2892_v41, %v961_v47 }
0x103f   :  { %965 = vrot.lane.b32.xlu1 %v963_v48, %s2981_s5 }
0x10b1   :  { %v966_v49 = vpop.permute.xlu1 %965 }
0x10b2   :  { %969 = vst.msk [vmem:[#allocation4 + $0x28] sm:$0xff] %vm321_vm2, %v966_v49  ;;  %2593 = vmatmul.mubr.msk.f32.vlgmr.msra.gmra.mrb[12].mxu0 %vm321_vm2, %v966_v49 }
0x10b3   :  { %2780 = vmatpush3.bf16.msra.mxu0 %v2377_v45  ;;  %2614 = vmatprep.mubr.msk.f32.mxu0 %vm321_vm2, %v1188_v51 }
0x10b4   :  { %2782 = vmatprep.subr.bf16.mxu0 %v2393_v50 }
0x10b7   :  { %2784 = vmatpush3.bf16.msra.mxu0 %v2393_v50 }
0x10b8   :  { %2797 = vmatprep.subr.bf16.mxu0 %v2977_v0 }
0x10b9   :  { %v1193_v56 = vld [vmem:[#allocation4 + $0x28] sm:$0xff] }
0x10ba   :  { %2615 = vmatmul.mubr.msk.f32.vlgmr.msra.gmra.mrb[14].mxu0 %vm321_vm2, %v1189_v52 }
0x10bb   :  { %2617 = vmatprep.mubr.msk.f32.mxu0 %vm321_vm2, %v1190_v53  ;;  %2799 = vmatpush3.bf16.msra.mxu0 %v3355_v61 }
0x10bc   :  { %2800 = vmatprep.subr.bf16.mxu0 %v2977_v0 }
0x10be   :  { %2618 = vmatmul.mubr.msk.f32.gmra.mrb[16].mxu0 %vm321_vm2, %v1191_v54 }
0x10bf   :  { %2620 = vmatprep.mubr.msk.f32.mxu0 %vm321_vm2, %v1192_v55  ;;  %2802 = vmatpush3.bf16.msra.mxu0 %v3362_v20 }
0x10c0   :  { %2809 = vmatprep.subr.bf16.mxu0 %v2977_v0 }
0x10c2   :  { %2621 = vmatmul.mubr.msk.f32.gmra.mrb[18].mxu0 %vm321_vm2, %v1193_v56 }
0x1185   :  { %v1044_v58 = vpop.f32.mrb[12].mxu0 }
0x1186   :  { %v1048_v59 = vadd.f32 %v1044_v58, %v288_v57  ;;  %v2594_v60 = vpop.f32.mrb[13].mxu0 }
0x1188   :  { %2895 = vtanh.f32 %v1048_v59  ;;  %v2332_v13 = vmul.f32 -1.442695, %v1048_v59 }
0x118a   :  { %2897 = vpow2.f32 %v2332_v13 }
0x118d   :  { %v3336_v62 = vpop.f32.mrb[14].mxu0 }
0x118e   :  { %v1301_v63 = vpop.f32.mrb[15].mxu0  ;;  %v1307_v58 = vadd.f32 %v3336_v62, %v3388_v16 }
0x118f   :  { %v1302_v29 = vadd.f32 %v3388_v16, %v1301_v63 }
0x1191   :  { %v3338_v2 = vpop.f32.mrb[16].mxu0 }
0x1192   :  { %v2896_v8 = vpop.eup %2895  ;;  %v3340_v10 = vpop.f32.mrb[17].mxu0 }
0x1193   :  { %1058 = vrot.lane.b32.xlu0 %v2896_v8, %s2980_s14 }
0x1194   :  { %v2898_v21 = vpop.eup %2897 }
0x1195   :  { %v3343_v11 = vpop.f32.mrb[18].mxu0  ;;  %v1052_v6 = vadd.f32 1.0, %v2898_v21 }
0x1196   :  { %v3345_v12 = vpop.f32.mrb[19].mxu0 }
0x1197   :  { %2899 = vrcp.f32 %v1052_v6 }
0x11a1   :  { %v2900_v7 = vpop.eup %2899 }
0x11a2   :  { %v1056_v19 = vmul.f32 %v2900_v7, %v957_v31 }
0x1205   :  { %v1059_v14 = vpop.permute.xlu0 %1058 }
0x1206   :  { %v1061_v9 = vmul.f32 %v2900_v7, %v1059_v14 }
0x1208   :  { %1063 = vrot.lane.b32.xlu1 %v1061_v9, %s2981_s5 }
0x127a   :  { %v1064_v17 = vpop.permute.xlu1 %1063 }
0x127b   :  { %v3348_v26 = vadd.f32 %v1064_v17, %v1056_v19 }
0x127d   :  { %2901 = vtanh.f32 %v3348_v26 }
0x1287   :  { %v2902_v32 = vpop.eup %2901 }
0x1288   :  { %1069 = vrot.lane.b32.xlu0 %v2902_v32, %s2980_s14 }
0x12fa   :  { %v1070_v3 = vpop.permute.xlu0 %1069 }
0x12fb   :  { %v1072_v5 = vmul.f32 %v2900_v7, %v1070_v3 }
0x12fd   :  { %1074 = vrot.lane.b32.xlu1 %v1072_v5, %s2981_s5 }
0x136f   :  { %v1075_v22 = vpop.permute.xlu1 %1074 }
0x1370   :  { %1078 = vst.msk [vmem:[#allocation4 + $0x30] sm:$0xff] %vm321_vm2, %v1075_v22  ;;  %2604 = vmatmul.mubr.msk.f32.vlgmr.msra.gmra.mrb[8].mxu1 %vm321_vm2, %v1075_v22 }
0x1371   :  { %2787 = vmatpush3.bf16.msra.mxu1 %v3355_v61  ;;  %2634 = vmatprep.mubr.msk.f32.mxu1 %vm2978_vm1, %v2979_v4 }
0x1372   :  { %2788 = vmatprep.subr.bf16.mxu1 %v2977_v0 }
0x1375   :  { %2790 = vmatpush3.bf16.msra.mxu1 %v3362_v20 }
0x1376   :  { %2791 = vmatprep.subr.bf16.mxu1 %v2977_v0 }
0x1377   :  { %v1194_v23 = vld [vmem:[#allocation4 + $0x30] sm:$0xff] }
0x1378   :  { %2635 = vmatmul.mubr.f32.vlgmr.msra.gmra.mrb[10].mxu1 %v2979_v4  ;;  %2623 = vmatprep.mubr.msk.f32.mxu0 %vm321_vm2, %v1194_v23 }
0x1379   :  { %2793 = vmatpush3.bf16.msra.mxu1 %v3355_v61  ;;  %2645 = vmatprep.mubr.msk.f32.mxu1 %vm2978_vm1, %v2979_v4 }
0x137a   :  { %2794 = vmatprep.subr.bf16.mxu1 %v2977_v0 }
0x137d   :  { %2796 = vmatpush3.bf16.msra.mxu1 %v3362_v20 }
0x137e   :  { %2803 = vmatprep.subr.bf16.mxu1 %v2977_v0 }
0x1443   :  { %v1153_v15 = vpop.f32.mrb[8].mxu1 }
0x1444   :  { %v1157_v25 = vadd.f32 %v1153_v15, %v293_v24  ;;  %v2605_v28 = vpop.f32.mrb[9].mxu1 }
0x1446   :  { %v2334_v44 = vmul.f32 -1.442695, %v1157_v25 }
0x144b   :  { %v1431_v30 = vpop.f32.mrb[10].mxu1 }
0x144c   :  { %v1435_v33 = vadd.f32 %v1431_v30, %v1302_v29  ;;  %v2636_v35 = vpop.f32.mrb[11].mxu1 }
0x144e   :  { %2903 = vtanh.f32 %v1435_v33  ;;  %v2344_v37 = vmul.f32 -1.442695, %v1435_v33 }
0x1450   :  { %2905 = vpow2.f32 %v2344_v37 }
0x1458   :  { %v2904_v36 = vpop.eup %2903 }
0x1459   :  { %1445 = vrot.lane.b32.xlu0 %v2904_v36, %s2980_s14 }
0x145a   :  { %v2906_v27 = vpop.eup %2905 }
0x145b   :  { %v1439_v34 = vadd.f32 1.0, %v2906_v27 }
0x145d   :  { %2907 = vrcp.f32 %v1439_v34 }
0x1467   :  { %v2908_v38 = vpop.eup %2907 }
0x1468   :  { %v1443_v40 = vmul.f32 0.0, %v2908_v38 }
0x14cb   :  { %v1446_v1 = vpop.permute.xlu0 %1445 }
0x14cc   :  { %v1448_v39 = vmul.f32 %v2908_v38, %v1446_v1 }
0x14ce   :  { %1450 = vrot.lane.b32.xlu1 %v1448_v39, %s2981_s5 }
0x1540   :  { %v1451_v41 = vpop.permute.xlu1 %1450 }
0x1541   :  { %v1453_v42 = vadd.f32 %v1451_v41, %v1443_v40 }
0x1543   :  { %2909 = vtanh.f32 %v1453_v42 }
0x1544   :  { %2911 = vtanh.f32 %v1157_v25  ;;  %v1312_v25 = vadd.f32 %v3388_v16, %v3340_v10 }
0x1545   :  { %2913 = vpow2.f32 %v2334_v44 }
0x154d   :  { %v2910_v18 = vpop.eup %2909 }
0x154e   :  { %1456 = vrot.lane.b32.xlu0 %v2910_v18, %s2980_s14  ;;  %v2912_v43 = vpop.eup %2911 }
0x154f   :  { %v2914_v31 = vpop.eup %2913 }
0x1550   :  { %v1161_v45 = vadd.f32 1.0, %v2914_v31 }
0x1552   :  { %1167 = vrot.lane.b32.xlu0 %v2912_v43, %s2980_s14  ;;  %2915 = vrcp.f32 %v1161_v45  ;;  %v1317_v43 = vadd.f32 %v3338_v2, %v3388_v16 }
0x155c   :  { %v2916_v48 = vpop.eup %2915 }
0x155d   :  { %v1165_v52 = vmul.f32 %v2916_v48, %v3348_v26 }
0x15c0   :  { %v1457_v46 = vpop.permute.xlu0 %1456 }
0x15c1   :  { %v1459_v47 = vmul.f32 %v2908_v38, %v1457_v46 }
0x15c3   :  { %1462 = vrot.lane.b32.xlu1 %v1459_v47, %s2981_s5 }
0x15c4   :  { %v1168_v49 = vpop.permute.xlu0 %1167 }
0x15c5   :  { %v1170_v50 = vmul.f32 %v2916_v48, %v1168_v49 }
0x15c7   :  { %1172 = vrot.lane.b32.xlu0 %v1170_v50, %s2981_s5 }
0x1635   :  { %v1463_v51 = vpop.permute.xlu1 %1462 }
0x1636   :  { %2646 = vmatmul.mubr.msk.f32.vlgmr.msra.gmra.mrb[12].mxu1 %vm321_vm2, %v1463_v51 }
0x1637   :  { %2805 = vmatpush3.bf16.msra.mxu1 %v3355_v61  ;;  %2667 = vmatprep.mubr.msk.f32.mxu1 %vm2978_vm1, %v2979_v4 }
0x1638   :  { %2806 = vmatprep.subr.bf16.mxu1 %v2977_v0 }
0x1639   :  { %v1173_v53 = vpop.permute.xlu0 %1172 }
0x163a   :  { %v1175_v54 = vadd.f32 %v1173_v53, %v1165_v52 }
0x163b   :  { %2808 = vmatpush3.bf16.msra.mxu1 %v3362_v20 }
0x163c   :  { %2917 = vtanh.f32 %v1175_v54  ;;  %2815 = vmatprep.subr.bf16.mxu1 %v2977_v0 }
0x1646   :  { %v2918_v55 = vpop.eup %2917 }
0x1647   :  { %1178 = vrot.lane.b32.xlu0 %v2918_v55, %s2980_s14 }
0x16b9   :  { %v1179_v56 = vpop.permute.xlu0 %1178 }
0x16ba   :  { %v1181_v57 = vmul.f32 %v2916_v48, %v1179_v56 }
0x16bc   :  { %1183 = vrot.lane.b32.xlu0 %v1181_v57, %s2981_s5 }
0x1709   :  { %v1532_v59 = vpop.f32.mrb[12].mxu1 }
0x170a   :  { %v1536_v60 = vadd.f32 %v1532_v59, %v1307_v58  ;;  %v2647_v63 = vpop.f32.mrb[13].mxu1  ;;  %v1322_v59 = vadd.f32 %v3388_v16, %v3345_v12 }
0x170c   :  { %2919 = vtanh.f32 %v1536_v60  ;;  %v2346_v6 = vmul.f32 -1.442695, %v1536_v60 }
0x170e   :  { %2921 = vpow2.f32 %v2346_v6 }
0x1716   :  { %v2920_v8 = vpop.eup %2919 }
0x1717   :  { %1546 = vrot.lane.b32.xlu1 %v2920_v8, %s2980_s14 }
0x1718   :  { %v2922_v7 = vpop.eup %2921 }
0x1719   :  { %v1540_v62 = vadd.f32 1.0, %v2922_v7 }
0x171b   :  { %2923 = vrcp.f32 %v1540_v62 }
0x1725   :  { %v2924_v14 = vpop.eup %2923 }
0x1726   :  { %v1544_v17 = vmul.f32 %v2924_v14, %v1453_v42 }
0x172e   :  { %v1184_v13 = vpop.permute.xlu0 %1183 }
0x172f   :  { %1187 = vst.msk [vmem:[#allocation4 + $0x38] sm:$0xff] %vm321_vm2, %v1184_v13 }
0x1736   :  { %v1195_v21 = vld [vmem:[#allocation4 + $0x38] sm:$0xff] }
0x1737   :  { %2624 = vmatmul.mubr.msk.f32.gmra.mrb[20].mxu0 %vm321_vm2, %v1195_v21 }
0x1738   :  { %2656 = vmatprep.mubr.msk.f32.mxu0 %vm2978_vm1, %v2979_v4 }
0x1789   :  { %v1547_v9 = vpop.permute.xlu1 %1546 }
0x178a   :  { %v1549_v19 = vmul.f32 %v2924_v14, %v1547_v9 }
0x178c   :  { %1551 = vrot.lane.b32.xlu1 %v1549_v19, %s2981_s5 }
0x17fe   :  { %v1552_v26 = vpop.permute.xlu1 %1551 }
0x17ff   :  { %v1554_v32 = vadd.f32 %v1552_v26, %v1544_v17 }
0x1801   :  { %2925 = vtanh.f32 %v1554_v32 }
0x180a   :  { %v3415_v3 = vpop.f32.mrb[20].mxu0 }
0x180b   :  { %v2926_v5 = vpop.eup %2925  ;;  %v3417_v22 = vpop.f32.mrb[21].mxu0 }
0x180c   :  { %1557 = vrot.lane.b32.xlu1 %v2926_v5, %s2980_s14 }
0x187e   :  { %v1558_v23 = vpop.permute.xlu1 %1557 }
0x187f   :  { %v1560_v24 = vmul.f32 %v2924_v14, %v1558_v23 }
0x1881   :  { %1563 = vrot.lane.b32.xlu1 %v1560_v24, %s2981_s5  ;;  %v1327_v24 = vadd.f32 %v3343_v11, %v3388_v16 }
0x18f3   :  { %v1564_v15 = vpop.permute.xlu1 %1563 }
0x18f4   :  { %2657 = vmatmul.mubr.msk.f32.vlgmr.msra.gmra.mrb[22].mxu0 %vm321_vm2, %v1564_v15 }
0x18f5   :  { %2811 = vmatpush3.bf16.msra.mxu0 %v3355_v61  ;;  %2678 = vmatprep.mubr.msk.f32.mxu0 %vm2978_vm1, %v2979_v4 }
0x18f6   :  { %2812 = vmatprep.subr.bf16.mxu0 %v2977_v0 }
0x18f9   :  { %2814 = vmatpush3.bf16.msra.mxu0 %v3362_v20 }
0x18fa   :  { %2821 = vmatprep.subr.bf16.mxu0 %v2977_v0 }
0x19c7   :  { %v1633_v28 = vpop.f32.mrb[22].mxu0 }
0x19c8   :  { %v1637_v29 = vadd.f32 %v1633_v28, %v1312_v25  ;;  %v2658_v30 = vpop.f32.mrb[23].mxu0 }
0x19ca   :  { %2927 = vtanh.f32 %v1637_v29  ;;  %v2348_v35 = vmul.f32 -1.442695, %v1637_v29 }
0x19cc   :  { %2929 = vpow2.f32 %v2348_v35 }
0x19d4   :  { %v2928_v33 = vpop.eup %2927 }
0x19d5   :  { %1647 = vrot.lane.b32.xlu0 %v2928_v33, %s2980_s14 }
0x19d6   :  { %v2930_v36 = vpop.eup %2929 }
0x19d7   :  { %v1641_v37 = vadd.f32 1.0, %v2930_v36 }
0x19d9   :  { %2931 = vrcp.f32 %v1641_v37 }
0x19e3   :  { %v2932_v27 = vpop.eup %2931 }
0x19e4   :  { %v1645_v1 = vmul.f32 %v2932_v27, %v1554_v32 }
0x1a47   :  { %v1648_v34 = vpop.permute.xlu0 %1647 }
0x1a48   :  { %v1650_v38 = vmul.f32 %v2932_v27, %v1648_v34 }
0x1a4a   :  { %1652 = vrot.lane.b32.xlu1 %v1650_v38, %s2981_s5 }
0x1abc   :  { %v1653_v39 = vpop.permute.xlu1 %1652 }
0x1abd   :  { %v1655_v10 = vadd.f32 %v1653_v39, %v1645_v1 }
0x1abf   :  { %2933 = vtanh.f32 %v1655_v10 }
0x1ac9   :  { %v2934_v40 = vpop.eup %2933 }
0x1aca   :  { %1658 = vrot.lane.b32.xlu0 %v2934_v40, %s2980_s14 }
0x1b3c   :  { %v1659_v41 = vpop.permute.xlu0 %1658 }
0x1b3d   :  { %v1661_v42 = vmul.f32 %v2932_v27, %v1659_v41 }
0x1b3f   :  { %1664 = vrot.lane.b32.xlu1 %v1661_v42, %s2981_s5 }
0x1bb1   :  { %v1665_v18 = vpop.permute.xlu1 %1664 }
0x1bb2   :  { %2668 = vmatmul.mubr.msk.f32.vlgmr.msra.gmra.mrb[14].mxu1 %vm321_vm2, %v1665_v18 }
0x1bb3   :  { %2817 = vmatpush3.bf16.msra.mxu1 %v3355_v61  ;;  %2689 = vmatprep.mubr.msk.f32.mxu1 %vm2978_vm1, %v2979_v4 }
0x1bb4   :  { %2818 = vmatprep.subr.bf16.mxu1 %v2977_v0 }
0x1bb7   :  { %2820 = vmatpush3.bf16.msra.mxu1 %v3362_v20 }
0x1bb8   :  { %2827 = vmatprep.subr.bf16.mxu1 %v2977_v0 }
0x1c85   :  { %v1734_v44 = vpop.f32.mrb[14].mxu1 }
0x1c86   :  { %v1738_v31 = vadd.f32 %v1734_v44, %v1317_v43  ;;  %v2669_v45 = vpop.f32.mrb[15].mxu1 }
0x1c88   :  { %2935 = vtanh.f32 %v1738_v31  ;;  %v2350_v47 = vmul.f32 -1.442695, %v1738_v31 }
0x1c8a   :  { %2937 = vpow2.f32 %v2350_v47 }
0x1c92   :  { %v2936_v46 = vpop.eup %2935 }
0x1c93   :  { %1748 = vrot.lane.b32.xlu0 %v2936_v46, %s2980_s14 }
0x1c94   :  { %v2938_v48 = vpop.eup %2937 }
0x1c95   :  { %v1742_v49 = vadd.f32 1.0, %v2938_v48 }
0x1c97   :  { %2939 = vrcp.f32 %v1742_v49 }
0x1ca1   :  { %v2940_v50 = vpop.eup %2939 }
0x1ca2   :  { %v1746_v53 = vmul.f32 %v2940_v50, %v1655_v10  ;;  %v1332_v10 = vadd.f32 %v3388_v16, %v3417_v22 }
0x1d05   :  { %v1749_v51 = vpop.permute.xlu0 %1748 }
0x1d06   :  { %v1751_v52 = vmul.f32 %v2940_v50, %v1749_v51 }
0x1d08   :  { %1753 = vrot.lane.b32.xlu1 %v1751_v52, %s2981_s5 }
0x1d7a   :  { %v1754_v54 = vpop.permute.xlu1 %1753 }
0x1d7b   :  { %v1756_v2 = vadd.f32 %v1754_v54, %v1746_v53  ;;  %v1337_v54 = vadd.f32 %v3415_v3, %v3388_v16  ;;  %v2360_v16 = vld [vmem:[%s3524_s9] ss:$0 sm:$0xff] }
0x1d7d   :  { %2941 = vtanh.f32 %v1756_v2 }
0x1d87   :  { %v2942_v55 = vpop.eup %2941 }
0x1d88   :  { %1759 = vrot.lane.b32.xlu0 %v2942_v55, %s2980_s14 }
0x1dfa   :  { %v1760_v56 = vpop.permute.xlu0 %1759 }
0x1dfb   :  { %v1762_v57 = vmul.f32 %v2940_v50, %v1760_v56 }
0x1dfd   :  { %1765 = vrot.lane.b32.xlu1 %v1762_v57, %s2981_s5 }
0x1e6f   :  { %v1766_v58 = vpop.permute.xlu1 %1765 }
0x1e70   :  { %2679 = vmatmul.mubr.msk.f32.vlgmr.msra.gmra.mrb[24].mxu0 %vm321_vm2, %v1766_v58 }
0x1e71   :  { %2823 = vmatpush3.bf16.msra.mxu0 %v3355_v61  ;;  %2700 = vmatprep.mubr.msk.f32.mxu0 %vm2978_vm1, %v2979_v4 }
0x1e72   :  { %2824 = vmatprep.subr.bf16.mxu0 %v2977_v0 }
0x1e75   :  { %2826 = vmatpush3.bf16.msra.mxu0 %v3362_v20 }
0x1e76   :  { %2833 = vmatprep.subr.bf16.mxu0 %v2977_v0 }
0x1f43   :  { %v1835_v60 = vpop.f32.mrb[24].mxu0 }
0x1f44   :  { %v1839_v63 = vadd.f32 %v1835_v60, %v1322_v59  ;;  %v2680_v8 = vpop.f32.mrb[25].mxu0 }
0x1f46   :  { %2943 = vtanh.f32 %v1839_v63  ;;  %v2352_v21 = vmul.f32 -1.442695, %v1839_v63 }
0x1f48   :  { %2945 = vpow2.f32 %v2352_v21 }
0x1f50   :  { %v2944_v13 = vpop.eup %2943 }
0x1f51   :  { %1849 = vrot.lane.b32.xlu0 %v2944_v13, %s2980_s14 }
0x1f52   :  { %v2946_v6 = vpop.eup %2945 }
0x1f53   :  { %v1843_v7 = vadd.f32 1.0, %v2946_v6 }
0x1f55   :  { %2947 = vrcp.f32 %v1843_v7 }
0x1f5f   :  { %v2948_v62 = vpop.eup %2947 }
0x1f60   :  { %v1847_v19 = vmul.f32 %v2948_v62, %v1756_v2 }
0x1fc3   :  { %v1850_v14 = vpop.permute.xlu0 %1849 }
0x1fc4   :  { %v1852_v9 = vmul.f32 %v2948_v62, %v1850_v14  ;;  %v2218_v14 = vld [vmem:[%s3526_s11] sm:$0xff] }
0x1fc6   :  { %1854 = vrot.lane.b32.xlu1 %v1852_v9, %s2981_s5  ;;  %v2219_v9 = vld [vmem:[%s3526_s11 + $0x8] sm:$0xff] }
0x2038   :  { %v1855_v17 = vpop.permute.xlu1 %1854 }
0x2039   :  { %v1857_v12 = vadd.f32 %v1855_v17, %v1847_v19  ;;  %v2220_v19 = vld [vmem:[%s3526_s11 + $0x10] sm:$0xff]  ;;  %v2834_v17 = vpack.c.bf16 %v2219_v9, %v2218_v14 }
0x203b   :  { %2949 = vtanh.f32 %v1857_v12 }
0x2045   :  { %v2950_v26 = vpop.eup %2949 }
0x2046   :  { %1860 = vrot.lane.b32.xlu0 %v2950_v26, %s2980_s14 }
0x20b8   :  { %v1861_v32 = vpop.permute.xlu0 %1860 }
0x20b9   :  { %v1863_v5 = vmul.f32 %v2948_v62, %v1861_v32  ;;  %v2361_v62 = vld [vmem:[%s3525_s10] ss:$0 sm:$0xff]  ;;  %v2167_v32 = vlaneseq }
0x20bb   :  { %1866 = vrot.lane.b32.xlu1 %v1863_v5, %s2981_s5  ;;  %v2168_v5 = vshrl.u32 %v2167_v32, 7 }
0x20bd   :  { %vm2169_vm3 = vcmp.lt.s32.totalorder %v2168_v5, 4 }
0x212d   :  { %v1867_v23 = vpop.permute.xlu1 %1866 }
0x212e   :  { %2690 = vmatmul.mubr.msk.f32.vlgmr.msra.gmra.mrb[16].mxu1 %vm321_vm2, %v1867_v23  ;;  %v2359_v23 = vsel %vm2169_vm3, 1.0, %v2979_v4 }
0x212f   :  { %2829 = vmatpush3.bf16.msra.mxu1 %v3355_v61  ;;  %2711 = vmatprep.mubr.msk.f32.mxu1 %vm2978_vm1, %v2979_v4 }
0x2130   :  { %2830 = vmatprep.subr.bf16.mxu1 %v2977_v0 }
0x2133   :  { %2832 = vmatpush3.bf16.msra.mxu1 %v3362_v20 }
0x2201   :  { %v1936_v15 = vpop.f32.mrb[16].mxu1 }
0x2202   :  { %v1940_v25 = vadd.f32 %v1936_v15, %v1327_v24  ;;  %v2691_v28 = vpop.f32.mrb[17].mxu1 }
0x2204   :  { %2951 = vtanh.f32 %v1940_v25  ;;  %v2354_v30 = vmul.f32 -1.442695, %v1940_v25 }
0x2206   :  { %2953 = vpow2.f32 %v2354_v30 }
0x220e   :  { %v2952_v29 = vpop.eup %2951 }
0x220f   :  { %1950 = vrot.lane.b32.xlu0 %v2952_v29, %s2980_s14 }
0x2210   :  { %v2954_v61 = vpop.eup %2953 }
0x2211   :  { %v1944_v33 = vadd.f32 1.0, %v2954_v61 }
0x2213   :  { %2955 = vrcp.f32 %v1944_v33 }
0x221d   :  { %v2956_v35 = vpop.eup %2955 }
0x221e   :  { %v1948_v20 = vmul.f32 %v2956_v35, %v1857_v12  ;;  %v2221_v12 = vld [vmem:[%s3526_s11 + $0x18] sm:$0xff] }
0x221f   :  { %v2837_v26 = vpack.c.bf16 %v2221_v12, %v2220_v19 }
0x2281   :  { %v1951_v36 = vpop.permute.xlu0 %1950 }
0x2282   :  { %v1953_v37 = vmul.f32 %v2956_v35, %v1951_v36 }
0x2284   :  { %1955 = vrot.lane.b32.xlu1 %v1953_v37, %s2981_s5 }
0x22f6   :  { %v1956_v27 = vpop.permute.xlu1 %1955 }
0x22f7   :  { %v1958_v11 = vadd.f32 %v1956_v27, %v1948_v20 }
0x22f9   :  { %2957 = vtanh.f32 %v1958_v11 }
0x2303   :  { %v2958_v34 = vpop.eup %2957 }
0x2304   :  { %1961 = vrot.lane.b32.xlu0 %v2958_v34, %s2980_s14 }
0x2376   :  { %v1962_v38 = vpop.permute.xlu0 %1961 }
0x2377   :  { %v1964_v1 = vmul.f32 %v2956_v35, %v1962_v38 }
0x2379   :  { %1967 = vrot.lane.b32.xlu1 %v1964_v1, %s2981_s5 }
0x23eb   :  { %v1968_v39 = vpop.permute.xlu1 %1967 }
0x23ec   :  { %2701 = vmatmul.mubr.msk.f32.vlgmr.msra.gmra.mrb[26].mxu0 %vm321_vm2, %v1968_v39 }
0x23ed   :  { %2722 = vmatprep.mubr.msk.f32.mxu0 %vm2978_vm1, %v2979_v4  ;;  %2835 = vmatpush3.bf16.msra.mxu0 %v2834_v17 }
0x23ee   :  { %2836 = vmatprep.subr.bf16.mxu0 %v2977_v0 }
0x23f1   :  { %2838 = vmatpush3.bf16.msra.mxu0 %v2837_v26 }
0x24bf   :  { %v2037_v40 = vpop.f32.mrb[26].mxu0 }
0x24c0   :  { %v2041_v41 = vadd.f32 %v2037_v40, %v1332_v10  ;;  %v2702_v42 = vpop.f32.mrb[27].mxu0 }
0x24c2   :  { %2959 = vtanh.f32 %v2041_v41  ;;  %v2356_v43 = vmul.f32 -1.442695, %v2041_v41 }
0x24c4   :  { %2961 = vpow2.f32 %v2356_v43 }
0x24cc   :  { %v2960_v18 = vpop.eup %2959 }
0x24cd   :  { %2051 = vrot.lane.b32.xlu0 %v2960_v18, %s2980_s14 }
0x24ce   :  { %v2962_v44 = vpop.eup %2961 }
0x24cf   :  { %v2045_v31 = vadd.f32 1.0, %v2962_v44 }
0x24d1   :  { %2963 = vrcp.f32 %v2045_v31 }
0x24db   :  { %v2964_v45 = vpop.eup %2963 }
0x24dc   :  { %v2049_v48 = vmul.f32 %v2964_v45, %v1958_v11 }
0x253f   :  { %v2052_v46 = vpop.permute.xlu0 %2051 }
0x2540   :  { %v2054_v47 = vmul.f32 %v2964_v45, %v2052_v46 }
0x2542   :  { %2056 = vrot.lane.b32.xlu1 %v2054_v47, %s2981_s5 }
0x25b4   :  { %v2057_v49 = vpop.permute.xlu1 %2056 }
0x25b5   :  { %v2059_v22 = vadd.f32 %v2057_v49, %v2049_v48  ;;  %v2362_v49 = vld [vmem:[%s3527_s12] ss:$0 sm:$0xff] }
0x25b7   :  { %2965 = vtanh.f32 %v2059_v22 }
0x25c1   :  { %v2966_v50 = vpop.eup %2965 }
0x25c2   :  { %2062 = vrot.lane.b32.xlu0 %v2966_v50, %s2980_s14 }
0x2634   :  { %v2063_v51 = vpop.permute.xlu0 %2062 }
0x2635   :  { %v2065_v52 = vmul.f32 %v2964_v45, %v2063_v51 }
0x2637   :  { %2068 = vrot.lane.b32.xlu1 %v2065_v52, %s2981_s5 }
0x26a9   :  { %v2069_v53 = vpop.permute.xlu1 %2068 }
0x26aa   :  { %2712 = vmatmul.mubr.msk.f32.vlgmr.msra.gmra.mrb[18].mxu1 %vm321_vm2, %v2069_v53 }
0x277d   :  { %v2138_v2 = vpop.f32.mrb[18].mxu1 }
0x277e   :  { %v2142_v55 = vadd.f32 %v2138_v2, %v1337_v54  ;;  %v2713_v56 = vpop.f32.mrb[19].mxu1 }
0x2780   :  { %2967 = vtanh.f32 %v2142_v55  ;;  %v2358_v58 = vmul.f32 -1.442695, %v2142_v55 }
0x2782   :  { %2969 = vpow2.f32 %v2358_v58 }
0x278a   :  { %v2968_v57 = vpop.eup %2967 }
0x278b   :  { %2152 = vrot.lane.b32.xlu0 %v2968_v57, %s2980_s14 }
0x278c   :  { %v2970_v59 = vpop.eup %2969 }
0x278d   :  { %v2146_v60 = vadd.f32 1.0, %v2970_v59 }
0x278f   :  { %2971 = vrcp.f32 %v2146_v60 }
0x2799   :  { %v2972_v63 = vpop.eup %2971 }
0x279a   :  { %v2150_v3 = vmul.f32 %v2972_v63, %v2059_v22 }
0x27fd   :  { %v2153_v8 = vpop.permute.xlu0 %2152 }
0x27fe   :  { %v2155_v13 = vmul.f32 %v2972_v63, %v2153_v8 }
0x2800   :  { %2157 = vrot.lane.b32.xlu1 %v2155_v13, %s2981_s5 }
0x2804   :  { %2204 = vrot.lane.b32.xlu1 %v2360_v16, %s2982_s23 }
0x2872   :  { %v2158_v21 = vpop.permute.xlu1 %2157 }
0x2873   :  { %v2160_v6 = vadd.f32 %v2158_v21, %v2150_v3 }
0x2875   :  { %2973 = vtanh.f32 %v2160_v6 }
0x2876   :  { %v2205_v44 = vpop.permute.xlu1 %2204 }
0x287f   :  { %v2974_v7 = vpop.eup %2973 }
0x2880   :  { %2163 = vrot.lane.b32.xlu0 %v2974_v7, %s2980_s14 }
0x2884   :  { %2214 = vrot.lane.b32.xlu0 %v2361_v62, %s2982_s23 }
0x28f2   :  { %v2164_v24 = vpop.permute.xlu0 %2163 }
0x28f3   :  { %v2166_v15 = vmul.f32 %v2972_v63, %v2164_v24 }
0x28f5   :  { %v2172_v25 = vmul.f32 %v2359_v23, %v2166_v15 }
0x28f6   :  { %v2215_v45 = vpop.permute.xlu0 %2214 }
0x28f7   :  { %v2174_v28 = vsel %vm2173_vm4, %v2172_v25, 0.0  ;;  %v2182_v29 = vmul.f32 %v2172_v25, %v2172_v25 }
0x28f8   :  { %v2175_v30 = vrot.slane %v2174_v28, 4 }
0x28f9   :  { %v2183_v61 = vsel %vm2173_vm4, %v2182_v29, 0.0 }
0x28fa   :  { %v2176_v33 = vadd.f32 %v2175_v30, %v2174_v28  ;;  %v2184_v35 = vrot.slane %v2183_v61, 4 }
0x28fc   :  { %v2177_v36 = vrot.slane %v2176_v33, 2  ;;  %v2185_v37 = vadd.f32 %v2184_v35, %v2183_v61 }
0x28fe   :  { %v2178_v20 = vadd.f32 %v2177_v36, %v2176_v33  ;;  %v2186_v0 = vrot.slane %v2185_v37, 2 }
0x2900   :  { %v2179_v27 = vrot.slane %v2178_v20, 1  ;;  %v2187_v11 = vadd.f32 %v2186_v0, %v2185_v37 }
0x2902   :  { %v2180_v34 = vadd.f32 %v2179_v27, %v2178_v20  ;;  %v2188_v38 = vrot.slane %v2187_v11, 1 }
0x2904   :  { %v2181_v1 = vmul.f32 0.25, %v2180_v34  ;;  %v2189_v4 = vadd.f32 %v2188_v38, %v2187_v11 }
0x2906   :  { %v2190_v39 = vmul.f32 0.25, %v2189_v4  ;;  %v2191_v10 = vmul.f32 %v2181_v1, %v2181_v1  ;;  %v2194_v18 = vsub.f32 %v2166_v15, %v2181_v1 }
0x2908   :  { %v2192_v40 = vsub.f32 %v2190_v39, %v2191_v10 }
0x290a   :  { %v2193_v41 = vmax.f32 %v2192_v40, 0.0 }
0x290c   :  { %v2195_v42 = vadd.f32 1e-05, %v2193_v41 }
0x290e   :  { %2975 = vrsqrt.f32 %v2195_v42 }
0x2918   :  { %v2976_v43 = vpop.eup %2975 }
0x2919   :  { %v2197_v31 = vmul.f32 %v2976_v43, %v2194_v18 }
0x291b   :  { %v2207_v46 = vmul.f32 %v2205_v44, %v2197_v31 }
0x291d   :  { %v2217_v47 = vadd.f32 %v2215_v45, %v2207_v46 }
0x291f   :  { %2230 = vrot.lane.b32.xlu1 %v2217_v47, %s2981_s5 }
0x2991   :  { %v2231_v48 = vpop.permute.xlu1 %2230 }
0x2992   :  { %2723 = vmatmul.mubr.msk.f32.vlgmr.msra.gmra.mrb[28].mxu0 %vm321_vm2, %v2231_v48 }
0x2a65   :  { %v2300_v22 = vpop.f32.mrb[28].mxu0 }
0x2a66   :  { %v2301_v50 = vadd.f32 %v2362_v49, %v2300_v22  ;;  %v2724_v51 = vpop.f32.mrb[29].mxu0 }
0x2a68   :  { %2304 = vst [vmem:[%s3528_s13] sm:$0xff] %v2301_v50 }

</bundles_post_ra>
